<compile_context>
chip_gen: v7x
topology: tpu7x:2x2x1
jax: 0.10.0
libtpu: 0.0.40
codegen_flags: <defaults>
</compile_context>

<pallas_src>
import math
from functools import partial

import jax
import jax.numpy as jnp
import numpy as np
from jax.experimental import pallas as pl
from jax.experimental.pallas import tpu as pltpu


# ---------------------------------------------------------------------------
# helpers
# ---------------------------------------------------------------------------
def _pick_tile(dim, target):
    """Largest multiple of 128 <= target that divides dim; else the full dim."""
    if dim <= target:
        return dim
    t = (target // 128) * 128
    while t >= 128:
        if dim % t == 0:
            return t
        t -= 128
    return dim  # odd dim (e.g. 320): fall back to the full extent


# ---------------------------------------------------------------------------
# Kernel 1: tiled linear (fc1)  --  K-accumulated MXU matmul + bias
# ---------------------------------------------------------------------------
def _linear_kernel(x_ref, w_ref, b_ref, o_ref, acc_ref):
    k = pl.program_id(2)

    @pl.when(k == 0)
    def _():
        acc_ref[...] = jnp.zeros_like(acc_ref)

    acc_ref[...] += jnp.dot(x_ref[...], w_ref[...],
                            preferred_element_type=jnp.float32)

    @pl.when(k == pl.num_programs(2) - 1)
    def _():
        o_ref[...] = (acc_ref[...] + b_ref[...].astype(jnp.float32)
                      ).astype(o_ref.dtype)


def linear(x2d, w, b, *, tm_target=512, tn_target=256, tk_target=512):
    M, K = x2d.shape
    Kw, N = w.shape
    assert K == Kw
    tm = _pick_tile(M, tm_target)
    tn = _pick_tile(N, tn_target)
    tk = _pick_tile(K, tk_target)
    grid = (M // tm, N // tn, K // tk)
    itemsize = x2d.dtype.itemsize
    return pl.pallas_call(
        _linear_kernel,
        out_shape=jax.ShapeDtypeStruct((M, N), x2d.dtype),
        grid_spec=pltpu.PrefetchScalarGridSpec(
            num_scalar_prefetch=0,
            grid=grid,
            in_specs=[
                pl.BlockSpec((tm, tk), lambda i, j, k: (i, k)),
                pl.BlockSpec((tk, tn), lambda i, j, k: (k, j)),
                pl.BlockSpec((1, tn), lambda i, j, k: (0, j)),
            ],
            out_specs=pl.BlockSpec((tm, tn), lambda i, j, k: (i, j)),
            scratch_shapes=[pltpu.VMEM((tm, tn), jnp.float32)],
        ),
        compiler_params=pltpu.CompilerParams(
            dimension_semantics=("parallel", "parallel", "arbitrary"),
            vmem_limit_bytes=32 * 1024 * 1024,
        ),
        cost_estimate=pl.CostEstimate(
            flops=2 * M * N * K,
            transcendentals=0,
            bytes_accessed=(M * K + K * N + M * N) * itemsize,
        ),
    )(x2d, w, b.reshape(1, N))


# ---------------------------------------------------------------------------
# Kernel 2: fused depthwise 3x3 conv (pad=1) + exact GELU + fc2
#   grid = (batch, C_out tiles, hidden tiles);  hidden axis is the reduction.
# ---------------------------------------------------------------------------
def _dwconv_gelu_fc2_kernel(h_ref, dww_ref, dwb_ref, w2_ref, b2_ref,
                            o_ref, acc_ref, *, H, W):
    k = pl.program_id(2)

    @pl.when(k == 0)
    def _():
        acc_ref[...] = jnp.zeros_like(acc_ref)

    # --- depthwise 3x3 conv on this hidden-channel tile (VPU, f32 math) -----
    x = h_ref[0].astype(jnp.float32)                      # (H, W, tk)
    tk_c = x.shape[-1]
    # build the 1-pixel zero halo in VMEM (no HBM padding pass)
    zrow = jnp.zeros((1, W, tk_c), jnp.float32)
    xp = jnp.concatenate([zrow, x, zrow], axis=0)         # (H+2, W, tk)
    zcol = jnp.zeros((H + 2, 1, tk_c), jnp.float32)
    xp = jnp.concatenate([zcol, xp, zcol], axis=1)        # (H+2, W+2, tk)

    wk = dww_ref[...].astype(jnp.float32)                 # (3, 3, tk)
    conv = jnp.zeros((H, W, tk_c), jnp.float32)
    for dh in range(3):
        for dw in range(3):
            conv = conv + xp[dh:dh + H, dw:dw + W, :] * wk[dh:dh + 1, dw:dw + 1, :]
    conv = conv + dwb_ref[...].astype(jnp.float32)        # (1,1,tk) broadcast

    # --- exact (erf-based) GELU, matching torch.nn.GELU() -------------------
    inv_sqrt2 = jnp.float32(0.7071067811865476)
    g = 0.5 * conv * (1.0 + jax.lax.erf(conv * inv_sqrt2))

    # --- fc2 partial product for this hidden tile (MXU) ---------------------
    g2 = g.reshape(H * W, tk_c).astype(w2_ref.dtype)
    acc_ref[...] += jnp.dot(g2, w2_ref[...], preferred_element_type=jnp.float32)

    @pl.when(k == pl.num_programs(2) - 1)
    def _():
        o_ref[0] = (acc_ref[...] + b2_ref[...].astype(jnp.float32)
                    ).astype(o_ref.dtype)


def dwconv_gelu_fc2(h_sp, dw_w, dw_b, w2, b2, *, tn_target=256, tk_target=512):
    B, H, W, hid = h_sp.shape
    hid2, C = w2.shape
    assert hid == hid2
    N = H * W
    tn = _pick_tile(C, tn_target)
    tk = _pick_tile(hid, tk_target)
    grid = (B, C // tn, hid // tk)
    itemsize = h_sp.dtype.itemsize
    kernel = partial(_dwconv_gelu_fc2_kernel, H=H, W=W)
    return pl.pallas_call(
        kernel,
        out_shape=jax.ShapeDtypeStruct((B, N, C), h_sp.dtype),
        grid_spec=pltpu.PrefetchScalarGridSpec(
            num_scalar_prefetch=0,
            grid=grid,
            in_specs=[
                pl.BlockSpec((1, H, W, tk), lambda b, j, k: (b, 0, 0, k)),
                pl.BlockSpec((3, 3, tk), lambda b, j, k: (0, 0, k)),
                pl.BlockSpec((1, 1, tk), lambda b, j, k: (0, 0, k)),
                pl.BlockSpec((tk, tn), lambda b, j, k: (k, j)),
                pl.BlockSpec((1, tn), lambda b, j, k: (0, j)),
            ],
            out_specs=pl.BlockSpec((1, N, tn), lambda b, j, k: (b, 0, j)),
            scratch_shapes=[pltpu.VMEM((N, tn), jnp.float32)],
        ),
        compiler_params=pltpu.CompilerParams(
            dimension_semantics=("parallel", "parallel", "arbitrary"),
            vmem_limit_bytes=32 * 1024 * 1024,
        ),
        cost_estimate=pl.CostEstimate(
            flops=2 * B * N * hid * C + 18 * B * N * hid,
            transcendentals=B * N * hid,
            bytes_accessed=(B * N * hid + hid * C + B * N * C) * itemsize,
        ),
    )(h_sp, dw_w, dw_b.reshape(1, 1, hid), w2, b2.reshape(1, C))


# ---------------------------------------------------------------------------
# PVT2FFN forward
# ---------------------------------------------------------------------------
def pvt2ffn_forward(x, H, W, params):
    B, N, C = x.shape
    assert N == H * W
    hid = params["w1"].shape[1]

    # fc1 (tiled matmul)
    h = linear(x.reshape(B * N, C), params["w1"], params["b1"])      # (B*N, hid)

    # fused dwconv3x3 + GELU + fc2 (hid-wide activation never round-trips HBM)
    h_sp = h.reshape(B, H, W, hid)                                   # free reshape
    out = dwconv_gelu_fc2(h_sp, params["dw_w"], params["dw_b"],
                          params["w2"], params["b2"])                # (B, N, C)
    return out
    # Further fusion of fc1 into the same pipeline is possible but left out
    # (requires halo-aware recompute of fc1 rows).


# ---------------------------------------------------------------------------
# Pure-JAX reference (for a sanity check)
# ---------------------------------------------------------------------------
def pvt2ffn_reference(x, H, W, params):
    B, N, C = x.shape
    h = x @ params["w1"] + params["b1"]
    hid = h.shape[-1]
    hs = h.reshape(B, H, W, hid)
    wk = params["dw_w"].reshape(3, 3, 1, hid)  # HWIO, I = C/groups = 1
    conv = jax.lax.conv_general_dilated(
        hs, wk, window_strides=(1, 1), padding="SAME",
        dimension_numbers=("NHWC", "HWIO", "NHWC"),
        feature_group_count=hid)
    conv = conv + params["dw_b"]
    g = jax.nn.gelu(conv, approximate=False)
    return g.reshape(B, N, hid) @ params["w2"] + params["b2"]


if __name__ == "__main__":
    # Small shapes consistent with the module: B=2, N=H*W=64, C=128, hidden=256
    # (128/256 keep all lane dims >=128-dense without padding).
    B, H, W = 2, 8, 8
    N = H * W
    C, HID = 128, 256

    key = jax.random.PRNGKey(0)
    kx, k1, k2, k3 = jax.random.split(key, 4)

    # Deterministic synthetic init mirroring PVT2FFN._init_weights
    params = {
        "w1": 0.02 * jax.random.truncated_normal(k1, -2.0, 2.0, (C, HID), jnp.float32),
        "b1": jnp.zeros((HID,), jnp.float32),
        "w2": 0.02 * jax.random.truncated_normal(k2, -2.0, 2.0, (HID, C), jnp.float32),
        "b2": jnp.zeros((C,), jnp.float32),
        # Conv2d(dim, dim, 3, groups=dim): fan_out = 3*3*dim/dim = 9
        "dw_w": math.sqrt(2.0 / 9.0) * jax.random.normal(k3, (3, 3, HID), jnp.float32),
        "dw_b": jnp.zeros((HID,), jnp.float32),
    }

    x = jax.random.normal(kx, (B, N, C), jnp.float32)

    out = jax.jit(pvt2ffn_forward, static_argnums=(1, 2))(x, H, W, params)
    out = jax.block_until_ready(out)

    ref = pvt2ffn_reference(x, H, W, params)
    np.testing.assert_allclose(np.asarray(out), np.asarray(ref), rtol=1e-4, atol=1e-4)

    print("KERNEL_OK")
</pallas_src>

<mosaic_0001>
module attributes {stable_mosaic.version = 11 : i64} {
  func.func @_linear_kernel(%arg0: i32, %arg1: i32, %arg2: i32, %arg3: memref<128x128xf32, #tpu.memory_space<vmem>>, %arg4: memref<128x256xf32, #tpu.memory_space<vmem>>, %arg5: memref<1x256xf32, #tpu.memory_space<vmem>>, %arg6: memref<128x256xf32, #tpu.memory_space<vmem>>, %arg7: memref<128x256xf32, #tpu.memory_space<vmem>>) attributes {dimension_semantics = [#tpu.dimension_semantics<parallel>, #tpu.dimension_semantics<parallel>, #tpu.dimension_semantics<arbitrary>], iteration_bounds = array<i64: 1, 1, 1>, scalar_prefetch = 0 : i64, scratch_operands = 1 : i64, tpu.core_type = #tpu.core_type<tc>, window_params = [{transform_indices = @transform_0, window_bounds = array<i64: 128, 128>}, {transform_indices = @transform_1, window_bounds = array<i64: 128, 256>}, {transform_indices = @transform_2, window_bounds = array<i64: 1, 256>}, {transform_indices = @transform_3, window_bounds = array<i64: 128, 256>}]} {
    %c0_i32 = arith.constant 0 : i32
    %0 = arith.cmpi eq, %arg2, %c0_i32 : i32
    %1 = arith.extui %0 : i1 to i32
    %c0_i32_0 = arith.constant 0 : i32
    %2 = arith.cmpi ne, %1, %c0_i32_0 : i32
    scf.if %2 {
      %cst_10 = arith.constant 0.000000e+00 : f32
      %12 = vector.broadcast %cst_10 : f32 to vector<128x256xf32>
      %c0_11 = arith.constant 0 : index
      %c0_12 = arith.constant 0 : index
      %13 = vector.load %arg7[%c0_11, %c0_12] : memref<128x256xf32, #tpu.memory_space<vmem>>, vector<128x256xf32>
      tpu.vector_store %arg7[%c0_11, %c0_12], %12 {strides = array<i32>} : memref<128x256xf32, #tpu.memory_space<vmem>>, vector<128x256xf32>,
    } else {
    }
    %c0 = arith.constant 0 : index
    %c0_1 = arith.constant 0 : index
    %3 = vector.load %arg7[%c0, %c0_1] : memref<128x256xf32, #tpu.memory_space<vmem>>, vector<128x256xf32>
    %c0_2 = arith.constant 0 : index
    %c0_3 = arith.constant 0 : index
    %4 = vector.load %arg3[%c0_2, %c0_3] : memref<128x128xf32, #tpu.memory_space<vmem>>, vector<128x128xf32>
    %c0_4 = arith.constant 0 : index
    %c0_5 = arith.constant 0 : index
    %5 = vector.load %arg4[%c0_4, %c0_5] : memref<128x256xf32, #tpu.memory_space<vmem>>, vector<128x256xf32>
    %cst = arith.constant dense<0.000000e+00> : vector<128x256xf32>
    %6 = tpu.matmul %4, %5, %cst {dimension_numbers = #tpu.dot_dimension_numbers<[1], [0], [0], [1], [0, 0, 1, 1], [], []>} : vector<128x128xf32>, vector<128x256xf32>, vector<128x256xf32> -> vector<128x256xf32>
    %7 = arith.addf %3, %6 : vector<128x256xf32>
    %c0_6 = arith.constant 0 : index
    %c0_7 = arith.constant 0 : index
    %8 = vector.load %arg7[%c0_6, %c0_7] : memref<128x256xf32, #tpu.memory_space<vmem>>, vector<128x256xf32>
    tpu.vector_store %arg7[%c0_6, %c0_7], %7 {strides = array<i32>} : memref<128x256xf32, #tpu.memory_space<vmem>>, vector<128x256xf32>,
    %c0_i32_8 = arith.constant 0 : i32
    %9 = arith.cmpi eq, %arg2, %c0_i32_8 : i32
    %10 = arith.extui %9 : i1 to i32
    %c0_i32_9 = arith.constant 0 : i32
    %11 = arith.cmpi ne, %10, %c0_i32_9 : i32
    scf.if %11 {
      %c0_10 = arith.constant 0 : index
      %c0_11 = arith.constant 0 : index
      %12 = vector.load %arg7[%c0_10, %c0_11] : memref<128x256xf32, #tpu.memory_space<vmem>>, vector<128x256xf32>
      %c0_12 = arith.constant 0 : index
      %c0_13 = arith.constant 0 : index
      %13 = vector.load %arg5[%c0_12, %c0_13] : memref<1x256xf32, #tpu.memory_space<vmem>>, vector<1x256xf32>
      %14 = vector.broadcast %13 : vector<1x256xf32> to vector<128x256xf32>
      %15 = arith.addf %12, %14 : vector<128x256xf32>
      %c0_14 = arith.constant 0 : index
      %c0_15 = arith.constant 0 : index
      %16 = vector.load %arg6[%c0_14, %c0_15] : memref<128x256xf32, #tpu.memory_space<vmem>>, vector<128x256xf32>
      tpu.vector_store %arg6[%c0_14, %c0_15], %15 {strides = array<i32>} : memref<128x256xf32, #tpu.memory_space<vmem>>, vector<128x256xf32>,
    } else {
    }
    return
  }
  func.func @transform_0(%arg0: i32, %arg1: i32, %arg2: i32) -> (i32, i32) {
    %c0_i32 = arith.constant 0 : i32
    return %arg0, %arg2 : i32, i32
  }
  func.func @transform_1(%arg0: i32, %arg1: i32, %arg2: i32) -> (i32, i32) {
    %c0_i32 = arith.constant 0 : i32
    return %arg2, %arg1 : i32, i32
  }
  func.func @transform_2(%arg0: i32, %arg1: i32, %arg2: i32) -> (i32, i32) {
    %c0_i32 = arith.constant 0 : i32
    %c0_i32_0 = arith.constant 0 : i32
    return %c0_i32, %arg1 : i32, i32
  }
  func.func @transform_3(%arg0: i32, %arg1: i32, %arg2: i32) -> (i32, i32) {
    %c0_i32 = arith.constant 0 : i32
    return %arg0, %arg1 : i32, i32
  }
}

module attributes {stable_mosaic.version = 11 : i64} {
  func.func @_dwconv_gelu_fc2_kernel(%arg0: i32, %arg1: i32, %arg2: i32, %arg3: memref<1x8x8x256xf32, #tpu.memory_space<vmem>>, %arg4: memref<3x3x256xf32, #tpu.memory_space<vmem>>, %arg5: memref<1x1x256xf32, #tpu.memory_space<vmem>>, %arg6: memref<256x128xf32, #tpu.memory_space<vmem>>, %arg7: memref<1x128xf32, #tpu.memory_space<vmem>>, %arg8: memref<1x64x128xf32, #tpu.memory_space<vmem>>, %arg9: memref<64x128xf32, #tpu.memory_space<vmem>>) attributes {dimension_semantics = [#tpu.dimension_semantics<parallel>, #tpu.dimension_semantics<parallel>, #tpu.dimension_semantics<arbitrary>], iteration_bounds = array<i64: 2, 1, 1>, scalar_prefetch = 0 : i64, scratch_operands = 1 : i64, tpu.core_type = #tpu.core_type<tc>, window_params = [{transform_indices = @transform_0, window_bounds = array<i64: 1, 8, 8, 256>}, {transform_indices = @transform_1, window_bounds = array<i64: 3, 3, 256>}, {transform_indices = @transform_2, window_bounds = array<i64: 1, 1, 256>}, {transform_indices = @transform_3, window_bounds = array<i64: 256, 128>}, {transform_indices = @transform_4, window_bounds = array<i64: 1, 128>}, {transform_indices = @transform_5, window_bounds = array<i64: 1, 64, 128>}]} {
    %c0_i32 = arith.constant 0 : i32
    %0 = arith.cmpi eq, %arg2, %c0_i32 : i32
    %1 = arith.extui %0 : i1 to i32
    %c0_i32_0 = arith.constant 0 : i32
    %2 = arith.cmpi ne, %1, %c0_i32_0 : i32
    scf.if %2 {
      %cst_24 = arith.constant 0.000000e+00 : f32
      %76 = vector.broadcast %cst_24 : f32 to vector<64x128xf32>
      %c0_25 = arith.constant 0 : index
      %c0_26 = arith.constant 0 : index
      %77 = vector.load %arg9[%c0_25, %c0_26] : memref<64x128xf32, #tpu.memory_space<vmem>>, vector<64x128xf32>
      tpu.vector_store %arg9[%c0_25, %c0_26], %76 {strides = array<i32>} : memref<64x128xf32, #tpu.memory_space<vmem>>, vector<64x128xf32>,
    } else {
    }
    %c0 = arith.constant 0 : index
    %c0_1 = arith.constant 0 : index
    %c0_2 = arith.constant 0 : index
    %c0_3 = arith.constant 0 : index
    %3 = vector.load %arg3[%c0, %c0_1, %c0_2, %c0_3] : memref<1x8x8x256xf32, #tpu.memory_space<vmem>>, vector<1x8x8x256xf32>
    %4 = vector.shape_cast %3 : vector<1x8x8x256xf32> to vector<8x8x256xf32>
    %cst = arith.constant 0.000000e+00 : f32
    %5 = vector.broadcast %cst : f32 to vector<1x8x256xf32>
    %6 = tpu.concatenate %5, %4, %5 in 0 : vector<1x8x256xf32>, vector<8x8x256xf32>, vector<1x8x256xf32> -> vector<10x8x256xf32>
    %cst_4 = arith.constant 0.000000e+00 : f32
    %7 = vector.broadcast %cst_4 : f32 to vector<10x1x256xf32>
    %8 = tpu.concatenate %7, %6, %7 in 1 : vector<10x1x256xf32>, vector<10x8x256xf32>, vector<10x1x256xf32> -> vector<10x10x256xf32>
    %c0_5 = arith.constant 0 : index
    %c0_6 = arith.constant 0 : index
    %c0_7 = arith.constant 0 : index
    %9 = vector.load %arg4[%c0_5, %c0_6, %c0_7] : memref<3x3x256xf32, #tpu.memory_space<vmem>>, vector<3x3x256xf32>
    %cst_8 = arith.constant 0.000000e+00 : f32
    %10 = vector.broadcast %cst_8 : f32 to vector<8x8x256xf32>
    %11 = vector.extract_strided_slice %8 {offsets = [0, 0, 0], sizes = [8, 8, 256], strides = [1, 1, 1]} : vector<10x10x256xf32> to vector<8x8x256xf32>
    %12 = vector.extract_strided_slice %9 {offsets = [0, 0, 0], sizes = [1, 1, 256], strides = [1, 1, 1]} : vector<3x3x256xf32> to vector<1x1x256xf32>
    %13 = vector.broadcast %12 : vector<1x1x256xf32> to vector<8x8x256xf32>
    %14 = arith.mulf %11, %13 : vector<8x8x256xf32>
    %15 = arith.addf %10, %14 : vector<8x8x256xf32>
    %16 = vector.extract_strided_slice %8 {offsets = [0, 1, 0], sizes = [8, 8, 256], strides = [1, 1, 1]} : vector<10x10x256xf32> to vector<8x8x256xf32>
    %17 = vector.extract_strided_slice %9 {offsets = [0, 1, 0], sizes = [1, 1, 256], strides = [1, 1, 1]} : vector<3x3x256xf32> to vector<1x1x256xf32>
    %18 = vector.broadcast %17 : vector<1x1x256xf32> to vector<8x8x256xf32>
    %19 = arith.mulf %16, %18 : vector<8x8x256xf32>
    %20 = arith.addf %15, %19 : vector<8x8x256xf32>
    %21 = vector.extract_strided_slice %8 {offsets = [0, 2, 0], sizes = [8, 8, 256], strides = [1, 1, 1]} : vector<10x10x256xf32> to vector<8x8x256xf32>
    %22 = vector.extract_strided_slice %9 {offsets = [0, 2, 0], sizes = [1, 1, 256], strides = [1, 1, 1]} : vector<3x3x256xf32> to vector<1x1x256xf32>
    %23 = vector.broadcast %22 : vector<1x1x256xf32> to vector<8x8x256xf32>
    %24 = arith.mulf %21, %23 : vector<8x8x256xf32>
    %25 = arith.addf %20, %24 : vector<8x8x256xf32>
    %26 = vector.extract_strided_slice %8 {offsets = [1, 0, 0], sizes = [8, 8, 256], strides = [1, 1, 1]} : vector<10x10x256xf32> to vector<8x8x256xf32>
    %27 = vector.extract_strided_slice %9 {offsets = [1, 0, 0], sizes = [1, 1, 256], strides = [1, 1, 1]} : vector<3x3x256xf32> to vector<1x1x256xf32>
    %28 = vector.broadcast %27 : vector<1x1x256xf32> to vector<8x8x256xf32>
    %29 = arith.mulf %26, %28 : vector<8x8x256xf32>
    %30 = arith.addf %25, %29 : vector<8x8x256xf32>
    %31 = vector.extract_strided_slice %8 {offsets = [1, 1, 0], sizes = [8, 8, 256], strides = [1, 1, 1]} : vector<10x10x256xf32> to vector<8x8x256xf32>
    %32 = vector.extract_strided_slice %9 {offsets = [1, 1, 0], sizes = [1, 1, 256], strides = [1, 1, 1]} : vector<3x3x256xf32> to vector<1x1x256xf32>
    %33 = vector.broadcast %32 : vector<1x1x256xf32> to vector<8x8x256xf32>
    %34 = arith.mulf %31, %33 : vector<8x8x256xf32>
    %35 = arith.addf %30, %34 : vector<8x8x256xf32>
    %36 = vector.extract_strided_slice %8 {offsets = [1, 2, 0], sizes = [8, 8, 256], strides = [1, 1, 1]} : vector<10x10x256xf32> to vector<8x8x256xf32>
    %37 = vector.extract_strided_slice %9 {offsets = [1, 2, 0], sizes = [1, 1, 256], strides = [1, 1, 1]} : vector<3x3x256xf32> to vector<1x1x256xf32>
    %38 = vector.broadcast %37 : vector<1x1x256xf32> to vector<8x8x256xf32>
    %39 = arith.mulf %36, %38 : vector<8x8x256xf32>
    %40 = arith.addf %35, %39 : vector<8x8x256xf32>
    %41 = vector.extract_strided_slice %8 {offsets = [2, 0, 0], sizes = [8, 8, 256], strides = [1, 1, 1]} : vector<10x10x256xf32> to vector<8x8x256xf32>
    %42 = vector.extract_strided_slice %9 {offsets = [2, 0, 0], sizes = [1, 1, 256], strides = [1, 1, 1]} : vector<3x3x256xf32> to vector<1x1x256xf32>
    %43 = vector.broadcast %42 : vector<1x1x256xf32> to vector<8x8x256xf32>
    %44 = arith.mulf %41, %43 : vector<8x8x256xf32>
    %45 = arith.addf %40, %44 : vector<8x8x256xf32>
    %46 = vector.extract_strided_slice %8 {offsets = [2, 1, 0], sizes = [8, 8, 256], strides = [1, 1, 1]} : vector<10x10x256xf32> to vector<8x8x256xf32>
    %47 = vector.extract_strided_slice %9 {offsets = [2, 1, 0], sizes = [1, 1, 256], strides = [1, 1, 1]} : vector<3x3x256xf32> to vector<1x1x256xf32>
    %48 = vector.broadcast %47 : vector<1x1x256xf32> to vector<8x8x256xf32>
    %49 = arith.mulf %46, %48 : vector<8x8x256xf32>
    %50 = arith.addf %45, %49 : vector<8x8x256xf32>
    %51 = vector.extract_strided_slice %8 {offsets = [2, 2, 0], sizes = [8, 8, 256], strides = [1, 1, 1]} : vector<10x10x256xf32> to vector<8x8x256xf32>
    %52 = vector.extract_strided_slice %9 {offsets = [2, 2, 0], sizes = [1, 1, 256], strides = [1, 1, 1]} : vector<3x3x256xf32> to vector<1x1x256xf32>
    %53 = vector.broadcast %52 : vector<1x1x256xf32> to vector<8x8x256xf32>
    %54 = arith.mulf %51, %53 : vector<8x8x256xf32>
    %55 = arith.addf %50, %54 : vector<8x8x256xf32>
    %c0_9 = arith.constant 0 : index
    %c0_10 = arith.constant 0 : index
    %c0_11 = arith.constant 0 : index
    %56 = vector.load %arg5[%c0_9, %c0_10, %c0_11] : memref<1x1x256xf32, #tpu.memory_space<vmem>>, vector<1x1x256xf32>
    %57 = vector.broadcast %56 : vector<1x1x256xf32> to vector<8x8x256xf32>
    %58 = arith.addf %55, %57 : vector<8x8x256xf32>
    %cst_12 = arith.constant 5.000000e-01 : f32
    %59 = vector.broadcast %cst_12 : f32 to vector<8x8x256xf32>
    %60 = arith.mulf %59, %58 : vector<8x8x256xf32>
    %cst_13 = arith.constant 0.707106769 : f32
    %61 = vector.broadcast %cst_13 : f32 to vector<8x8x256xf32>
    %62 = arith.mulf %58, %61 : vector<8x8x256xf32>
    %63 = math.erf %62 : vector<8x8x256xf32>
    %cst_14 = arith.constant 1.000000e+00 : f32
    %64 = vector.broadcast %cst_14 : f32 to vector<8x8x256xf32>
    %65 = arith.addf %64, %63 : vector<8x8x256xf32>
    %66 = arith.mulf %60, %65 : vector<8x8x256xf32>
    %67 = vector.shape_cast %66 : vector<8x8x256xf32> to vector<64x256xf32>
    %c0_15 = arith.constant 0 : index
    %c0_16 = arith.constant 0 : index
    %68 = vector.load %arg9[%c0_15, %c0_16] : memref<64x128xf32, #tpu.memory_space<vmem>>, vector<64x128xf32>
    %c0_17 = arith.constant 0 : index
    %c0_18 = arith.constant 0 : index
    %69 = vector.load %arg6[%c0_17, %c0_18] : memref<256x128xf32, #tpu.memory_space<vmem>>, vector<256x128xf32>
    %cst_19 = arith.constant dense<0.000000e+00> : vector<64x128xf32>
    %70 = tpu.matmul %67, %69, %cst_19 {dimension_numbers = #tpu.dot_dimension_numbers<[1], [0], [0], [1], [0, 0, 1, 1], [], []>} : vector<64x256xf32>, vector<256x128xf32>, vector<64x128xf32> -> vector<64x128xf32>
    %71 = arith.addf %68, %70 : vector<64x128xf32>
    %c0_20 = arith.constant 0 : index
    %c0_21 = arith.constant 0 : index
    %72 = vector.load %arg9[%c0_20, %c0_21] : memref<64x128xf32, #tpu.memory_space<vmem>>, vector<64x128xf32>
    tpu.vector_store %arg9[%c0_20, %c0_21], %71 {strides = array<i32>} : memref<64x128xf32, #tpu.memory_space<vmem>>, vector<64x128xf32>,
    %c0_i32_22 = arith.constant 0 : i32
    %73 = arith.cmpi eq, %arg2, %c0_i32_22 : i32
    %74 = arith.extui %73 : i1 to i32
    %c0_i32_23 = arith.constant 0 : i32
    %75 = arith.cmpi ne, %74, %c0_i32_23 : i32
    scf.if %75 {
      %c0_24 = arith.constant 0 : index
      %c0_25 = arith.constant 0 : index
      %76 = vector.load %arg9[%c0_24, %c0_25] : memref<64x128xf32, #tpu.memory_space<vmem>>, vector<64x128xf32>
      %c0_26 = arith.constant 0 : index
      %c0_27 = arith.constant 0 : index
      %77 = vector.load %arg7[%c0_26, %c0_27] : memref<1x128xf32, #tpu.memory_space<vmem>>, vector<1x128xf32>
      %78 = vector.broadcast %77 : vector<1x128xf32> to vector<64x128xf32>
      %79 = arith.addf %76, %78 : vector<64x128xf32>
      %c0_28 = arith.constant 0 : index
      %c0_29 = arith.constant 0 : index
      %c0_30 = arith.constant 0 : index
      %80 = vector.load %arg8[%c0_28, %c0_29, %c0_30] : memref<1x64x128xf32, #tpu.memory_space<vmem>>, vector<1x64x128xf32>
      %81 = vector.shape_cast %80 : vector<1x64x128xf32> to vector<64x128xf32>
      %82 = vector.shape_cast %79 : vector<64x128xf32> to vector<1x64x128xf32>
      tpu.vector_store %arg8[%c0_28, %c0_29, %c0_30], %82 {strides = array<i32>} : memref<1x64x128xf32, #tpu.memory_space<vmem>>, vector<1x64x128xf32>,
    } else {
    }
    return
  }
  func.func @transform_0(%arg0: i32, %arg1: i32, %arg2: i32) -> (i32, i32, i32, i32) {
    %c0_i32 = arith.constant 0 : i32
    %c0_i32_0 = arith.constant 0 : i32
    %c0_i32_1 = arith.constant 0 : i32
    return %arg0, %c0_i32, %c0_i32_0, %arg2 : i32, i32, i32, i32
  }
  func.func @transform_1(%arg0: i32, %arg1: i32, %arg2: i32) -> (i32, i32, i32) {
    %c0_i32 = arith.constant 0 : i32
    %c0_i32_0 = arith.constant 0 : i32
    %c0_i32_1 = arith.constant 0 : i32
    return %c0_i32, %c0_i32_0, %arg2 : i32, i32, i32
  }
  func.func @transform_2(%arg0: i32, %arg1: i32, %arg2: i32) -> (i32, i32, i32) {
    %c0_i32 = arith.constant 0 : i32
    %c0_i32_0 = arith.constant 0 : i32
    %c0_i32_1 = arith.constant 0 : i32
    return %c0_i32, %c0_i32_0, %arg2 : i32, i32, i32
  }
  func.func @transform_3(%arg0: i32, %arg1: i32, %arg2: i32) -> (i32, i32) {
    %c0_i32 = arith.constant 0 : i32
    return %arg2, %arg1 : i32, i32
  }
  func.func @transform_4(%arg0: i32, %arg1: i32, %arg2: i32) -> (i32, i32) {
    %c0_i32 = arith.constant 0 : i32
    %c0_i32_0 = arith.constant 0 : i32
    return %c0_i32, %arg1 : i32, i32
  }
  func.func @transform_5(%arg0: i32, %arg1: i32, %arg2: i32) -> (i32, i32, i32) {
    %c0_i32 = arith.constant 0 : i32
    %c0_i32_0 = arith.constant 0 : i32
    return %arg0, %c0_i32, %arg1 : i32, i32, i32
  }
}

</mosaic_0001>

<bundles_post_ra>
// kernel: pvt2ffn_forward.2
= control target key start
LH: loop header
LB: loop body
LE: loop exit
PB: predicated region body
PF: predicated region fallthrough
CT: control target
= control target key end

     0   :  { %8 = vsyncpa [#allocation4], 0  ;;  %s805_s0 = inlined_call_operand.hbm [shape: f32[128,128], index: 0, kind: input, shape index: {}]   ;;  %s806_s1 = inlined_call_operand.hbm [shape: f32[128,256], index: 1, kind: input, shape index: {}]   ;;  %s807_s2 = inlined_call_operand.vmem [shape: f32[1,256], index: 2, kind: input, shape index: {}]   ;;  %s808_s3 = inlined_call_operand.vmem [shape: f32[128,256], index: 3, kind: output, shape index: {}]  }
   0x1   :  { %9 = vsyncpa [#allocation6], 0  ;;  %s603_s12 = smov [#allocation3]   ;;  %s555_s16 = scalar_lea.hbm %s805_s0, 2048 }
   0x2   :  { %s15_s13 = sshll.u32 %s603_s12, 4  ;;  %p556_p0 = scmp.ne.s32.totalorder %s805_s0, %s555_s16  ;;  %s16_s13 = int_to_ptr.vmem [resolvable:$true] %s15_s13 }
   0x3   :  { %p559_p1 = scmp.lt.u32.totalorder %s555_s16, %s805_s0 }
   0x5   :  { %p561_p2 = pnand %p559_p1, %p556_p0 }
   0x7   :  { %564 = shalt.err (!%p561_p2)
}
   0x8   :  { %s565_s21 = scalar_lea.vmem %s16_s13, 2048  ;;  %p570_p4 = scmp.lt.s32.totalorder %s16_s13, %s16_s13 }
   0x9   :  { %p566_p3 = scmp.ne.s32.totalorder %s16_s13, %s565_s21  ;;  %p571_p5 = scmp.lt.s32.totalorder %s565_s21, %s565_s21 }
   0xb   :  { %p572_p6 = por %p571_p5, %p570_p4 }
   0xd   :  { %p573_p7 = pnand %p572_p6, %p566_p3 }
   0xf   :  { %576 = shalt.err (!%p573_p7)
}
  0x10   :  { %s604_s22 = smov 128   ;;  %s605_s23 = smov 8  }
  0x11   :  { %21 = dma.hbm_to_vmem [thread:$0]  %s805_s0, 2048, %s16_s13, [#allocation4], %s604_s22, %s604_s22, %s605_s23  }
  0x12   :  { %s606_s26 = smov [#allocation5]   ;;  %s577_s30 = scalar_lea.hbm %s806_s1, 4096 }
  0x13   :  { %s27_s27 = sshll.u32 %s606_s26, 4  ;;  %p578_p8 = scmp.ne.s32.totalorder %s806_s1, %s577_s30  ;;  %s28_s27 = int_to_ptr.vmem [resolvable:$true] %s27_s27 }
  0x14   :  { %p581_p9 = scmp.lt.u32.totalorder %s577_s30, %s806_s1 }
  0x16   :  { %p583_p10 = pnand %p581_p9, %p578_p8 }
  0x18   :  { %586 = shalt.err (!%p583_p10)
}
  0x19   :  { %s587_s8 = scalar_lea.vmem %s28_s27, 4096  ;;  %p592_p12 = scmp.lt.s32.totalorder %s28_s27, %s28_s27 }
  0x1a   :  { %p588_p11 = scmp.ne.s32.totalorder %s28_s27, %s587_s8  ;;  %p593_p13 = scmp.lt.s32.totalorder %s587_s8, %s587_s8 }
  0x1c   :  { %p594_p0 = por %p593_p13, %p592_p12 }
  0x1e   :  { %p595_p1 = pnand %p594_p0, %p588_p11 }
  0x20   :  { %598 = shalt.err (!%p595_p1)
}
  0x21   :  { %s607_s0 = smov 256   ;;  %s608_s9 = smov 16  }
  0x22   :  { %33 = dma.hbm_to_vmem [thread:$0]  %s806_s1, 4096, %s28_s27, [#allocation6], %s607_s0, %s607_s0, %s608_s9  }
  0x23   :  { %599 = dma.done.wait [#allocation4], 2048  }
  0x24   :  { %600 = vsyncadd [#allocation4], 4294965248 }
  0x25   :  { %601 = dma.done.wait [#allocation6], 4096  }
  0x26   :  { %602 = vsyncadd [#allocation6], 4294963200  ;;  %v609_v0 = vmov 0.0   ;;  %v127_v1 = vld [vmem:[#allocation5 + $0x8] sm:$0xff]  ;;  %v129_v2 = vld [vmem:[#allocation5 + $0x18] sm:$0xff] }
  0x27   :  { %222 = vmatprep.mubr.f32.mxu0 %v609_v0  ;;  %270 = vmatprep.mubr.f32.mxu1 %v609_v0  ;;  %v126_v3 = vld [vmem:[#allocation5] sm:$0xff]  ;;  %v500_v4 = vpack.c.bf16 %v129_v2, %v127_v1  ;;  %v128_v5 = vld [vmem:[#allocation5 + $0x10] sm:$0xff]  ;;  %v131_v6 = vld [vmem:[#allocation5 + $0x28] sm:$0xff]  ;;  %v420_v2 = vlaneseq }
  0x28   :  { %v133_v7 = vld [vmem:[#allocation5 + $0x38] sm:$0xff]  ;;  %v502_v8 = vpack.c.bf16 %v128_v5, %v126_v3  ;;  %v130_v10 = vld [vmem:[#allocation5 + $0x20] sm:$0xff]  ;;  %v132_v11 = vld [vmem:[#allocation5 + $0x30] sm:$0xff] }
  0x29   :  { %v504_v9 = vpack.c.bf16 %v133_v7, %v131_v6  ;;  %v135_v12 = vld [vmem:[#allocation5 + $0x48] sm:$0xff]  ;;  %501 = vmatprep.subr.bf16.mxu0 %v500_v4  ;;  %532 = vmatprep.subr.bf16.mxu1 %v500_v4  ;;  %v137_v13 = vld [vmem:[#allocation5 + $0x58] sm:$0xff]  ;;  %v506_v14 = vpack.c.bf16 %v132_v11, %v130_v10  ;;  %v134_v16 = vld [vmem:[#allocation5 + $0x40] sm:$0xff]  ;;  %v421_v3 = vshrl.u32 %v420_v2, 7 }
  0x2a   :  { %503 = vmatpush1.bf16.msra.mxu0 %v502_v8  ;;  %540 = vmatpush1.bf16.msra.mxu1 %v502_v8  ;;  %v508_v15 = vpack.c.bf16 %v137_v13, %v135_v12  ;;  %v136_v17 = vld [vmem:[#allocation5 + $0x50] sm:$0xff]  ;;  %v139_v18 = vld [vmem:[#allocation5 + $0x68] sm:$0xff]  ;;  %v141_v19 = vld [vmem:[#allocation5 + $0x78] sm:$0xff] }
  0x2b   :  { %505 = vmatprep.subr.bf16.mxu0 %v504_v9  ;;  %533 = vmatprep.subr.bf16.mxu1 %v504_v9  ;;  %v510_v20 = vpack.c.bf16 %v136_v17, %v134_v16  ;;  %v512_v21 = vpack.c.bf16 %v141_v19, %v139_v18  ;;  %v138_v22 = vld [vmem:[#allocation5 + $0x60] sm:$0xff]  ;;  %v140_v23 = vld [vmem:[#allocation5 + $0x70] sm:$0xff]  ;;  %v143_v24 = vld [vmem:[#allocation5 + $0x88] sm:$0xff]  ;;  %v422_v4 = vsub.s32 0, %v421_v3  ;;  %v426_v6 = vsub.s32 1, %v421_v3 }
  0x2c   :  { %v145_v25 = vld [vmem:[#allocation5 + $0x98] sm:$0xff]  ;;  %v514_v26 = vpack.c.bf16 %v140_v23, %v138_v22  ;;  %v142_v28 = vld [vmem:[#allocation5 + $0x80] sm:$0xff]  ;;  %v144_v29 = vld [vmem:[#allocation5 + $0x90] sm:$0xff] }
  0x2d   :  { %v516_v27 = vpack.c.bf16 %v145_v25, %v143_v24  ;;  %v147_v30 = vld [vmem:[#allocation5 + $0xa8] sm:$0xff]  ;;  %v149_v31 = vld [vmem:[#allocation5 + $0xb8] sm:$0xff]  ;;  %v518_v32 = vpack.c.bf16 %v144_v29, %v142_v28  ;;  %v146_v34 = vld [vmem:[#allocation5 + $0xa0] sm:$0xff] }
  0x2e   :  { %507 = vmatpush1.bf16.msra.mxu0 %v506_v14  ;;  %541 = vmatpush1.bf16.msra.mxu1 %v506_v14  ;;  %v520_v33 = vpack.c.bf16 %v149_v31, %v147_v30  ;;  %v148_v35 = vld [vmem:[#allocation5 + $0xb0] sm:$0xff]  ;;  %v151_v36 = vld [vmem:[#allocation5 + $0xc8] sm:$0xff]  ;;  %v153_v37 = vld [vmem:[#allocation5 + $0xd8] sm:$0xff] }
  0x2f   :  { %509 = vmatprep.subr.bf16.mxu0 %v508_v15  ;;  %534 = vmatprep.subr.bf16.mxu1 %v508_v15  ;;  %v522_v38 = vpack.c.bf16 %v148_v35, %v146_v34  ;;  %v524_v39 = vpack.c.bf16 %v153_v37, %v151_v36  ;;  %v150_v40 = vld [vmem:[#allocation5 + $0xc0] sm:$0xff]  ;;  %v152_v41 = vld [vmem:[#allocation5 + $0xd0] sm:$0xff]  ;;  %v155_v42 = vld [vmem:[#allocation5 + $0xe8] sm:$0xff] }
  0x30   :  { %v157_v43 = vld [vmem:[#allocation5 + $0xf8] sm:$0xff]  ;;  %v526_v44 = vpack.c.bf16 %v152_v41, %v150_v40  ;;  %v154_v46 = vld [vmem:[#allocation5 + $0xe0] sm:$0xff]  ;;  %v156_v47 = vld [vmem:[#allocation5 + $0xf0] sm:$0xff] }
  0x31   :  { %v528_v45 = vpack.c.bf16 %v157_v43, %v155_v42  ;;  %v530_v48 = vpack.c.bf16 %v156_v47, %v154_v46  ;;  %v110_v49 = vld [vmem:[#allocation3] sm:$0xff]  ;;  %v111_v51 = vld [vmem:[#allocation3 + $0x8] sm:$0xff]  ;;  %v112_v53 = vld [vmem:[#allocation3 + $0x10] sm:$0xff] }
  0x32   :  { %511 = vmatpush1.bf16.msra.mxu0 %v510_v20  ;;  %542 = vmatpush1.bf16.msra.mxu1 %v510_v20  ;;  %v118_v50 = vld [vmem:[#allocation3 + $0x40] sm:$0xff]  ;;  %v119_v52 = vld [vmem:[#allocation3 + $0x48] sm:$0xff]  ;;  %v120_v54 = vld [vmem:[#allocation3 + $0x50] sm:$0xff] }
  0x33   :  { %513 = vmatprep.subr.bf16.mxu0 %v512_v21  ;;  %535 = vmatprep.subr.bf16.mxu1 %v512_v21  ;;  %v113_v55 = vld [vmem:[#allocation3 + $0x18] sm:$0xff]  ;;  %v114_v57 = vld [vmem:[#allocation3 + $0x20] sm:$0xff]  ;;  %v115_v59 = vld [vmem:[#allocation3 + $0x28] sm:$0xff] }
  0x34   :  { %v121_v56 = vld [vmem:[#allocation3 + $0x58] sm:$0xff]  ;;  %v122_v58 = vld [vmem:[#allocation3 + $0x60] sm:$0xff]  ;;  %v123_v60 = vld [vmem:[#allocation3 + $0x68] sm:$0xff] }
  0x35   :  { %v116_v61 = vld [vmem:[#allocation3 + $0x30] sm:$0xff]  ;;  %v117_v63 = vld [vmem:[#allocation3 + $0x38] sm:$0xff]  ;;  %v418_v5 = vld [vmem:[%s807_s2] sm:$0x3] }
  0x36   :  { %515 = vmatpush1.bf16.msra.mxu0 %v514_v26  ;;  %543 = vmatpush1.bf16.msra.mxu1 %v514_v26  ;;  %v124_v62 = vld [vmem:[#allocation3 + $0x70] sm:$0xff]  ;;  %v125_v1 = vld [vmem:[#allocation3 + $0x78] sm:$0xff]  ;;  %v673_v7 = vrot.slane %v418_v5, %v422_v4  ;;  %v675_v8 = vrot.slane %v418_v5, %v426_v6 }
  0x37   :  { %517 = vmatprep.subr.bf16.mxu0 %v516_v27  ;;  %536 = vmatprep.subr.bf16.mxu1 %v516_v27 }
  0x3a   :  { %519 = vmatpush1.bf16.msra.mxu0 %v518_v32  ;;  %544 = vmatpush1.bf16.msra.mxu1 %v518_v32 }
  0x3b   :  { %521 = vmatprep.subr.bf16.mxu0 %v520_v33  ;;  %537 = vmatprep.subr.bf16.mxu1 %v520_v33 }
  0x3e   :  { %523 = vmatpush1.bf16.msra.mxu0 %v522_v38  ;;  %545 = vmatpush1.bf16.msra.mxu1 %v522_v38 }
  0x3f   :  { %525 = vmatprep.subr.bf16.mxu0 %v524_v39  ;;  %538 = vmatprep.subr.bf16.mxu1 %v524_v39 }
  0x42   :  { %527 = vmatpush1.bf16.msra.mxu0 %v526_v44  ;;  %546 = vmatpush1.bf16.msra.mxu1 %v526_v44 }
  0x43   :  { %529 = vmatprep.subr.bf16.mxu0 %v528_v45  ;;  %539 = vmatprep.subr.bf16.mxu1 %v528_v45 }
  0x46   :  { %531 = vmatpush1.bf16.msra.mxu0 %v530_v48  ;;  %547 = vmatpush1.bf16.msra.mxu1 %v530_v48 }
  0x49   :  { %223 = vmatmul.mubr.f32.vlgmr.msra.gmra.mrb[0].mxu0 %v110_v49  ;;  %271 = vmatmul.mubr.f32.vlgmr.msra.gmra.mrb[0].mxu1 %v118_v50 }
  0x4a   :  { %228 = vmatprep.mubr.f32.mxu0 %v609_v0  ;;  %276 = vmatprep.mubr.f32.mxu1 %v609_v0 }
  0x4d   :  { %229 = vmatmul.mubr.f32.gmra.mrb[2].mxu0 %v111_v51  ;;  %277 = vmatmul.mubr.f32.gmra.mrb[2].mxu1 %v119_v52 }
  0x4e   :  { %234 = vmatprep.mubr.f32.mxu0 %v609_v0  ;;  %282 = vmatprep.mubr.f32.mxu1 %v609_v0 }
  0x51   :  { %235 = vmatmul.mubr.f32.gmra.mrb[4].mxu0 %v112_v53  ;;  %283 = vmatmul.mubr.f32.gmra.mrb[4].mxu1 %v120_v54 }
  0x52   :  { %240 = vmatprep.mubr.f32.mxu0 %v609_v0  ;;  %288 = vmatprep.mubr.f32.mxu1 %v609_v0 }
  0x55   :  { %241 = vmatmul.mubr.f32.gmra.mrb[6].mxu0 %v113_v55  ;;  %289 = vmatmul.mubr.f32.gmra.mrb[6].mxu1 %v121_v56 }
  0x56   :  { %246 = vmatprep.mubr.f32.mxu0 %v609_v0  ;;  %294 = vmatprep.mubr.f32.mxu1 %v609_v0 }
  0x59   :  { %247 = vmatmul.mubr.f32.gmra.mrb[8].mxu0 %v114_v57  ;;  %295 = vmatmul.mubr.f32.gmra.mrb[8].mxu1 %v122_v58 }
  0x5a   :  { %252 = vmatprep.mubr.f32.mxu0 %v609_v0  ;;  %300 = vmatprep.mubr.f32.mxu1 %v609_v0 }
  0x5d   :  { %253 = vmatmul.mubr.f32.gmra.mrb[10].mxu0 %v115_v59  ;;  %301 = vmatmul.mubr.f32.gmra.mrb[10].mxu1 %v123_v60 }
  0x5e   :  { %258 = vmatprep.mubr.f32.mxu0 %v609_v0  ;;  %306 = vmatprep.mubr.f32.mxu1 %v609_v0 }
  0x61   :  { %259 = vmatmul.mubr.f32.gmra.mrb[12].mxu0 %v116_v61  ;;  %307 = vmatmul.mubr.f32.gmra.mrb[12].mxu1 %v124_v62 }
  0x62   :  { %264 = vmatprep.mubr.f32.mxu0 %v609_v0  ;;  %312 = vmatprep.mubr.f32.mxu1 %v609_v0 }
  0x65   :  { %265 = vmatmul.mubr.f32.gmra.mrb[14].mxu0 %v117_v63  ;;  %313 = vmatmul.mubr.f32.gmra.mrb[14].mxu1 %v125_v1 }
 0x11c   :  { %v224_v9 = vpop.f32.mrb[0].mxu0  ;;  %v272_v10 = vpop.f32.mrb[0].mxu1 }
 0x11d   :  { %v430_v0 = vadd.f32 %v673_v7, %v224_v9  ;;  %v446_v11 = vadd.f32 %v673_v7, %v272_v10  ;;  %v226_v12 = vpop.f32.mrb[1].mxu0  ;;  %v274_v13 = vpop.f32.mrb[1].mxu1 }
 0x11e   :  { %v431_v14 = vadd.f32 %v675_v8, %v226_v12  ;;  %v447_v15 = vadd.f32 %v675_v8, %v274_v13 }
 0x11f   :  { %462 = vst [vmem:[%s808_s3] sm:$0xff] %v430_v0  ;;  %478 = vst [vmem:[%s808_s3 + $0x80] sm:$0xff] %v446_v11 }
 0x120   :  { %463 = vst [vmem:[%s808_s3 + $0x8] sm:$0xff] %v431_v14  ;;  %479 = vst [vmem:[%s808_s3 + $0x88] sm:$0xff] %v447_v15  ;;  %v230_v16 = vpop.f32.mrb[2].mxu0  ;;  %v278_v17 = vpop.f32.mrb[2].mxu1 }
 0x121   :  { %v432_v18 = vadd.f32 %v673_v7, %v230_v16  ;;  %v448_v19 = vadd.f32 %v673_v7, %v278_v17  ;;  %v232_v20 = vpop.f32.mrb[3].mxu0  ;;  %v280_v21 = vpop.f32.mrb[3].mxu1 }
 0x122   :  { %v433_v22 = vadd.f32 %v675_v8, %v232_v20  ;;  %v449_v23 = vadd.f32 %v675_v8, %v280_v21 }
 0x123   :  { %464 = vst [vmem:[%s808_s3 + $0x10] sm:$0xff] %v432_v18  ;;  %480 = vst [vmem:[%s808_s3 + $0x90] sm:$0xff] %v448_v19 }
 0x124   :  { %465 = vst [vmem:[%s808_s3 + $0x18] sm:$0xff] %v433_v22  ;;  %481 = vst [vmem:[%s808_s3 + $0x98] sm:$0xff] %v449_v23  ;;  %v236_v24 = vpop.f32.mrb[4].mxu0  ;;  %v284_v25 = vpop.f32.mrb[4].mxu1 }
 0x125   :  { %v434_v26 = vadd.f32 %v673_v7, %v236_v24  ;;  %v450_v27 = vadd.f32 %v673_v7, %v284_v25  ;;  %v238_v28 = vpop.f32.mrb[5].mxu0  ;;  %v286_v29 = vpop.f32.mrb[5].mxu1 }
 0x126   :  { %v435_v30 = vadd.f32 %v675_v8, %v238_v28  ;;  %v451_v31 = vadd.f32 %v675_v8, %v286_v29 }
 0x127   :  { %466 = vst [vmem:[%s808_s3 + $0x20] sm:$0xff] %v434_v26  ;;  %482 = vst [vmem:[%s808_s3 + $0xa0] sm:$0xff] %v450_v27 }
 0x128   :  { %467 = vst [vmem:[%s808_s3 + $0x28] sm:$0xff] %v435_v30  ;;  %483 = vst [vmem:[%s808_s3 + $0xa8] sm:$0xff] %v451_v31  ;;  %v242_v32 = vpop.f32.mrb[6].mxu0  ;;  %v290_v33 = vpop.f32.mrb[6].mxu1 }
 0x129   :  { %v436_v34 = vadd.f32 %v673_v7, %v242_v32  ;;  %v452_v35 = vadd.f32 %v673_v7, %v290_v33  ;;  %v244_v36 = vpop.f32.mrb[7].mxu0  ;;  %v292_v37 = vpop.f32.mrb[7].mxu1 }
 0x12a   :  { %v437_v38 = vadd.f32 %v675_v8, %v244_v36  ;;  %v453_v39 = vadd.f32 %v675_v8, %v292_v37 }
 0x12b   :  { %468 = vst [vmem:[%s808_s3 + $0x30] sm:$0xff] %v436_v34  ;;  %484 = vst [vmem:[%s808_s3 + $0xb0] sm:$0xff] %v452_v35 }
 0x12c   :  { %469 = vst [vmem:[%s808_s3 + $0x38] sm:$0xff] %v437_v38  ;;  %485 = vst [vmem:[%s808_s3 + $0xb8] sm:$0xff] %v453_v39  ;;  %v248_v40 = vpop.f32.mrb[8].mxu0  ;;  %v296_v41 = vpop.f32.mrb[8].mxu1 }
 0x12d   :  { %v438_v42 = vadd.f32 %v673_v7, %v248_v40  ;;  %v454_v43 = vadd.f32 %v673_v7, %v296_v41  ;;  %v250_v44 = vpop.f32.mrb[9].mxu0  ;;  %v298_v45 = vpop.f32.mrb[9].mxu1 }
 0x12e   :  { %v439_v46 = vadd.f32 %v675_v8, %v250_v44  ;;  %v455_v47 = vadd.f32 %v675_v8, %v298_v45 }
 0x12f   :  { %470 = vst [vmem:[%s808_s3 + $0x40] sm:$0xff] %v438_v42  ;;  %486 = vst [vmem:[%s808_s3 + $0xc0] sm:$0xff] %v454_v43 }
 0x130   :  { %471 = vst [vmem:[%s808_s3 + $0x48] sm:$0xff] %v439_v46  ;;  %487 = vst [vmem:[%s808_s3 + $0xc8] sm:$0xff] %v455_v47  ;;  %v254_v48 = vpop.f32.mrb[10].mxu0  ;;  %v302_v49 = vpop.f32.mrb[10].mxu1 }
 0x131   :  { %v440_v50 = vadd.f32 %v673_v7, %v254_v48  ;;  %v456_v51 = vadd.f32 %v673_v7, %v302_v49  ;;  %v256_v52 = vpop.f32.mrb[11].mxu0  ;;  %v304_v53 = vpop.f32.mrb[11].mxu1 }
 0x132   :  { %v441_v54 = vadd.f32 %v675_v8, %v256_v52  ;;  %v457_v55 = vadd.f32 %v675_v8, %v304_v53 }
 0x133   :  { %472 = vst [vmem:[%s808_s3 + $0x50] sm:$0xff] %v440_v50  ;;  %488 = vst [vmem:[%s808_s3 + $0xd0] sm:$0xff] %v456_v51 }
 0x134   :  { %473 = vst [vmem:[%s808_s3 + $0x58] sm:$0xff] %v441_v54  ;;  %489 = vst [vmem:[%s808_s3 + $0xd8] sm:$0xff] %v457_v55  ;;  %v260_v56 = vpop.f32.mrb[12].mxu0  ;;  %v308_v57 = vpop.f32.mrb[12].mxu1 }
 0x135   :  { %v442_v58 = vadd.f32 %v673_v7, %v260_v56  ;;  %v458_v59 = vadd.f32 %v673_v7, %v308_v57  ;;  %v262_v60 = vpop.f32.mrb[13].mxu0  ;;  %v310_v61 = vpop.f32.mrb[13].mxu1 }
 0x136   :  { %v443_v62 = vadd.f32 %v675_v8, %v262_v60  ;;  %v459_v63 = vadd.f32 %v675_v8, %v310_v61 }
 0x137   :  { %474 = vst [vmem:[%s808_s3 + $0x60] sm:$0xff] %v442_v58  ;;  %490 = vst [vmem:[%s808_s3 + $0xe0] sm:$0xff] %v458_v59 }
 0x138   :  { %475 = vst [vmem:[%s808_s3 + $0x68] sm:$0xff] %v443_v62  ;;  %491 = vst [vmem:[%s808_s3 + $0xe8] sm:$0xff] %v459_v63  ;;  %v266_v1 = vpop.f32.mrb[14].mxu0  ;;  %v314_v2 = vpop.f32.mrb[14].mxu1 }
 0x139   :  { %v444_v3 = vadd.f32 %v673_v7, %v266_v1  ;;  %v460_v4 = vadd.f32 %v673_v7, %v314_v2  ;;  %v268_v5 = vpop.f32.mrb[15].mxu0  ;;  %v316_v6 = vpop.f32.mrb[15].mxu1 }
 0x13a   :  { %v445_v9 = vadd.f32 %v675_v8, %v268_v5  ;;  %v461_v10 = vadd.f32 %v675_v8, %v316_v6 }
 0x13b   :  { %476 = vst [vmem:[%s808_s3 + $0x70] sm:$0xff] %v444_v3  ;;  %492 = vst [vmem:[%s808_s3 + $0xf0] sm:$0xff] %v460_v4 }
 0x13c   :  { %477 = vst [vmem:[%s808_s3 + $0x78] sm:$0xff] %v445_v9  ;;  %493 = vst [vmem:[%s808_s3 + $0xf8] sm:$0xff] %v461_v10 }
 0x13d   :  { %498 = vsyncpa [#allocation4], 1 }
 0x13e   :  { %499 = vsyncpa [#allocation6], 1 }

// kernel: pvt2ffn_forward.3
= control target key start
LH: loop header
LB: loop body
LE: loop exit
PB: predicated region body
PF: predicated region fallthrough
CT: control target
= control target key end

     0   :  { %10 = vsyncpa [#allocation4], 0  ;;  %s3500_s0 = inlined_call_operand.vmem [shape: f32[2,8,8,256], index: 0, kind: input, shape index: {}]   ;;  %s3501_s1 = inlined_call_operand.vmem [shape: f32[3,3,256], index: 1, kind: input, shape index: {}]   ;;  %s3502_s2 = inlined_call_operand.vmem [shape: f32[1,1,256], index: 2, kind: input, shape index: {}]   ;;  %s3503_s3 = inlined_call_operand.vmem [shape: f32[256,128], index: 3, kind: input, shape index: {}]   ;;  %s3504_s4 = inlined_call_operand.vmem [shape: f32[1,128], index: 4, kind: input, shape index: {}]   ;;  %s3505_s5 = inlined_call_operand.hbm [shape: f32[2,64,128], index: 5, kind: output, shape index: {}]  }
   0x1   :  { %12 = vsyncpa [#allocation4 + $0x1], 0  ;;  %s2376_s18 = smov 0   ;;  %s2378_s19 = smov 0  }
   0x2   :  { %s2380_s20 = smov 0   ;;  %s2382_s21 = smov 0  }
   0x3   :  { %s2384_s22 = smov 0   ;;  %s2386_s23 = smov 0  }
   0x4 LB: > { %s2048_s24 = sadd.s32 4294967295, %s2340_s23   ;;  %s2049_s25 = sadd.s32 4294967294, %s2340_s23   ;;  %s2340_s23 = sphi %s2386_s23, %s18_s23   ;;  %s2336_s22 = sphi %s2384_s22, %s3558_s22   ;;  %s2332_s21 = sphi %s2382_s21, %s3557_s21   ;;  %s2328_s20 = sphi %s2380_s20, %s3556_s20   ;;  %s2324_s19 = sphi %s2378_s19, %s3555_s19   ;;  %s2320_s18 = sphi %s2376_s18, %s3554_s18  }
   0x5   : > { %s37_s26 = sadd.s32 1, %s2336_s22  ;;  %s180_s27 = sadd.s32 1, %s2328_s20 }
   0x6   : > { %p39_p0 = scmp.ge.s32.totalorder %s37_s26, 2  ;;  %p190_p1 = scmp.ne.s32.totalorder %s2328_s20, %s2324_s19 }
   0x7   : > { %p191_p2 = scmp.eq.s32.totalorder %s2048_s24, 1  ;;  %p196_p3 = scmp.ne.s32.totalorder %s2324_s19, %s2320_s18 }
   0x8   : > { %s3560_s26 = smov (%p39_p0, %s37_s26), 0  ;;  %p197_p5 = scmp.eq.s32.totalorder %s2049_s25, 1 }
   0x9   : > { %p2416_p4 = por %p191_p2, %p190_p1  ;;  %s175_s29 = ssub.s32 %s2336_s22, %s3560_s26 }
   0xa   : > { %p2056_p6 = scmp.ge.s32.totalorder %s2340_s23, 1  ;;  %p178_p7 = scmp.eq.s32.totalorder %s175_s29, 0 }
   0xb   : > { %p2423_p8 = por %p197_p5, %p196_p3  ;;  %p263_p9 = scmp.lt.s32.totalorder %s2340_s23, 3 }
   0xc   : > { %s2429_s6 = scalar_select %p178_p7, %s2328_s20, %s180_s27  }
   0xd   : > { %p264_p10 = pnand %p2056_p6, %p263_p9 }
   0xf   : > { %267 = sbr.rel (%p264_p10) target bundleno = 500 (0x1f4), region = 40 }
  0x16   : > { %v1724_v0 = vld [vmem:[%s3503_s3 + $0x80] sm:$0xff]  ;;  %v1725_v1 = vld [vmem:[%s3503_s3 + $0x88] sm:$0xff]  ;;  %p316_p11 = scmp.lt.s32.totalorder %s2332_s21, 1  ;;  %v466_v3 = vlaneseq  ;;  %v1726_v6 = vld [vmem:[%s3503_s3 + $0x90] sm:$0xff]  ;;  %v2342_v16 = vmov 0.0   ;;  %vm427_vm0 = vcmask 1040384  }
  0x17   : > { %v1708_v2 = vld [vmem:[%s3503_s3] sm:$0xff]  ;;  %v2124_v4 = vpack.c.bf16 %v1725_v1, %v1724_v0  ;;  %v1709_v5 = vld [vmem:[%s3503_s3 + $0x8] sm:$0xff]  ;;  %v1727_v7 = vld [vmem:[%s3503_s3 + $0x98] sm:$0xff]  ;;  %v393_v17 = vrot.slane %v2342_v16, 7  ;;  %vm598_vm1 = vcmask 1046528   ;;  %vm761_vm2 = vcmask 1045504  }
  0x18   : > { %v2126_v8 = vpack.c.bf16 %v1709_v5, %v1708_v2  ;;  %v2128_v9 = vpack.c.bf16 %v1727_v7, %v1726_v6  ;;  %v1710_v10 = vld [vmem:[%s3503_s3 + $0x10] sm:$0xff]  ;;  %v1711_v11 = vld [vmem:[%s3503_s3 + $0x18] sm:$0xff]  ;;  %v1728_v12 = vld [vmem:[%s3503_s3 + $0xa0] sm:$0xff]  ;;  %s2460_s10 = scalar_select %p316_p11, %s2332_s21, 1  ;;  %v467_v22 = vshrl.u32 %v466_v3, 7 }
  0x19   : > { %2125 = vmatprep.subr.bf16.mxu0 %v2124_v4  ;;  %2156 = vmatprep.subr.bf16.mxu1 %v2124_v4  ;;  %v1729_v13 = vld [vmem:[%s3503_s3 + $0xa8] sm:$0xff]  ;;  %v1712_v14 = vld [vmem:[%s3503_s3 + $0x20] sm:$0xff]  ;;  %v2130_v18 = vpack.c.bf16 %v1711_v11, %v1710_v10  ;;  %v1730_v19 = vld [vmem:[%s3503_s3 + $0xb0] sm:$0xff]  ;;  %v2509_v33 = vsel %vm427_vm0, 0.0, %v393_v17  ;;  %v2512_v34 = vsel %vm427_vm0, %v393_v17, 0.0  ;;  %s312_s12 = sand.u32 1, %s2324_s19  }
  0x1a   : > { %v1713_v15 = vld [vmem:[%s3503_s3 + $0x28] sm:$0xff]  ;;  %2127 = vmatpush3.bf16.msra.mxu0 %v2126_v8  ;;  %2164 = vmatpush3.bf16.msra.mxu1 %v2126_v8  ;;  %v1731_v20 = vld [vmem:[%s3503_s3 + $0xb8] sm:$0xff]  ;;  %v1714_v21 = vld [vmem:[%s3503_s3 + $0x30] sm:$0xff]  ;;  %v2132_v23 = vpack.c.bf16 %v1729_v13, %v1728_v12  ;;  %s2066_s29 = sshll.u32 %s2460_s10, 7  ;;  %3530 = vst [vmem:[#allocation6_spill] sm:$0xff] %v2509_v33  ;;  %v2514_v35 = vsub.s32 0, %v467_v22 }
  0x1b   : > { %2129 = vmatprep.subr.bf16.mxu0 %v2128_v9  ;;  %2157 = vmatprep.subr.bf16.mxu1 %v2128_v9  ;;  %v1715_v24 = vld [vmem:[%s3503_s3 + $0x38] sm:$0xff]  ;;  %v1732_v25 = vld [vmem:[%s3503_s3 + $0xc0] sm:$0xff]  ;;  %v1733_v26 = vld [vmem:[%s3503_s3 + $0xc8] sm:$0xff]  ;;  %3531 = vst [vmem:[#allocation7_spill] sm:$0xff] %v2512_v34  ;;  %v2134_v36 = vpack.c.bf16 %v1713_v15, %v1712_v14  ;;  %v2525_v40 = vsub.s32 4, %v467_v22  ;;  %v2527_v41 = vsub.s32 1, %v467_v22  ;;  %v2136_v43 = vpack.c.bf16 %v1731_v20, %v1730_v19  ;;  %s2543_s10 = scalar_lea.vmem %s3500_s0, %s2066_s29 }
  0x1c   : > { %v1716_v27 = vld [vmem:[%s3503_s3 + $0x40] sm:$0xff]  ;;  %v1717_v28 = vld [vmem:[%s3503_s3 + $0x48] sm:$0xff]  ;;  %v1734_v29 = vld [vmem:[%s3503_s3 + $0xd0] sm:$0xff]  ;;  %v2529_v42 = vsub.s32 5, %v467_v22  ;;  %v2138_v44 = vpack.c.bf16 %v1715_v24, %v1714_v21  ;;  %v2545_v48 = vsub.s32 2, %v467_v22  ;;  %v2547_v49 = vsub.s32 6, %v467_v22 }
  0x1d   : > { %v1735_v30 = vld [vmem:[%s3503_s3 + $0xd8] sm:$0xff]  ;;  %v1718_v31 = vld [vmem:[%s3503_s3 + $0x50] sm:$0xff]  ;;  %v1736_v37 = vld [vmem:[%s3503_s3 + $0xe0] sm:$0xff]  ;;  %v2140_v50 = vpack.c.bf16 %v1733_v26, %v1732_v25  ;;  %v2142_v51 = vpack.c.bf16 %v1717_v28, %v1716_v27  ;;  %s2057_s13 = sshll.u32 %s312_s12, 6  ;;  %s2067_s16 = sshll.u32 %s2332_s21, 10 }
  0x1e   : > { %v1719_v32 = vld [vmem:[%s3503_s3 + $0x58] sm:$0xff]  ;;  %2131 = vmatpush3.bf16.msra.mxu0 %v2130_v18  ;;  %2165 = vmatpush3.bf16.msra.mxu1 %v2130_v18  ;;  %v1737_v38 = vld [vmem:[%s3503_s3 + $0xe8] sm:$0xff]  ;;  %v1720_v39 = vld [vmem:[%s3503_s3 + $0x60] sm:$0xff]  ;;  %v2549_v52 = vpack.c.bf16 %v1735_v30, %v1734_v29  ;;  %s3433_s15 = scalar_lea.vmem [#allocation3], %s2057_s13  ;;  %s3447_s25 = scalar_lea.hbm %s3505_s5, %s2067_s16 }
  0x1f   : > { %2133 = vmatprep.subr.bf16.mxu0 %v2132_v23  ;;  %2158 = vmatprep.subr.bf16.mxu1 %v2132_v23  ;;  %v1721_v45 = vld [vmem:[%s3503_s3 + $0x68] sm:$0xff]  ;;  %v1738_v46 = vld [vmem:[%s3503_s3 + $0xf0] sm:$0xff]  ;;  %v1739_v47 = vld [vmem:[%s3503_s3 + $0xf8] sm:$0xff]  ;;  %v2551_v53 = vpack.c.bf16 %v1719_v32, %v1718_v31  ;;  %v2560_v57 = vpack.c.bf16 %v1737_v38, %v1736_v37  ;;  %s1910_s17 = sshll.u32 %s3433_s15, 4  ;;  %s3454_s27 = scalar_lea.sflag [#allocation4], %s312_s12  ;;  %s3449_s17 = int_to_ptr.vmem [resolvable:$true] %s1910_s17 }
  0x20   : > { %v1722_v54 = vld [vmem:[%s3503_s3 + $0x70] sm:$0xff]  ;;  %v1723_v55 = vld [vmem:[%s3503_s3 + $0x78] sm:$0xff]  ;;  %v361_v56 = vld [vmem:[%s2543_s10 + $0x8] sm:$0xff]  ;;  %v2562_v58 = vpack.c.bf16 %v1721_v45, %v1720_v39  ;;  %v2564_v59 = vpack.c.bf16 %v1739_v47, %v1738_v46  ;;  %s2262_s7 = scalar_lea.vmem %s3449_s17, 1024  ;;  %s2343_s21 = smov [#allocation3]  }
  0x21   : > { %v363_v60 = vld [vmem:[%s2543_s10 + $0x18] sm:$0xff]  ;;  %v395_v61 = vrot.slane %v361_v56, 7  ;;  %v2570_v62 = vld [vmem:[%s3501_s1] sm:$0x77]  ;;  %v2575_v0 = vld [vmem:[%s3501_s1 + $0x8] sm:$0x77]  ;;  %v2583_v4 = vpack.c.bf16 %v1723_v55, %v1722_v54  ;;  %p2263_p12 = scmp.ne.s32.totalorder %s3449_s17, %s2262_s7 }
  0x22   : > { %2135 = vmatpush3.bf16.msra.mxu0 %v2134_v36  ;;  %2166 = vmatpush3.bf16.msra.mxu1 %v2134_v36  ;;  %v397_v63 = vrot.slane %v363_v60, 7  ;;  %v473_v1 = vrot.slane %v2570_v62, %v2525_v40  ;;  %v519_v2 = vrot.slane %v2570_v62, %v2527_v41  ;;  %v523_v3 = vrot.slane %v2570_v62, %v2529_v42  ;;  %v2605_v12 = vld [vmem:[%s2543_s10 + $0x38] sm:$0xff]  ;;  %v2628_v21 = vld [vmem:[%s2543_s10 + $0x48] sm:$0xff]  ;;  %v2653_v30 = vld [vmem:[%s3501_s1 + $0x10] sm:$0x77]  ;;  %s2266_s8 = sshll.u32 %s2343_s21, 4  ;;  %s2267_s8 = int_to_ptr.vmem [resolvable:$false] %s2266_s8 }
  0x23   : > { %2137 = vmatprep.subr.bf16.mxu0 %v2136_v43  ;;  %2159 = vmatprep.subr.bf16.mxu1 %v2136_v43  ;;  %v2586_v5 = vsel %vm427_vm0, 0.0, %v395_v61  ;;  %v682_v6 = vrot.slane %v2570_v62, %v2545_v48  ;;  %v686_v7 = vrot.slane %v2570_v62, %v2547_v49  ;;  %v2596_v9 = vsel %vm427_vm0, %v395_v61, 0.0  ;;  %p2264_p13 = pnand %p2263_p12, %p2416_p4  ;;  %s2268_s9 = scalar_lea.vmem %s2267_s8, 2048 }
  0x24   : > { %v2593_v8 = vsel %vm427_vm0, 0.0, %v397_v63  ;;  %v2599_v10 = vrot.slane %v473_v1, %v2514_v35  ;;  %v2602_v11 = vrot.slane %v519_v2, %v2527_v41  ;;  %v2608_v13 = vrot.slane %v523_v3, %v2527_v41  ;;  %p2269_p1 = scmp.lt.s32.totalorder %s3449_s17, %s2267_s8  ;;  %p2270_p2 = scmp.lt.s32.totalorder %s2268_s9, %s2262_s7 }
  0x25   : > { %v2611_v14 = vrot.slane %v682_v6, %v2545_v48  ;;  %v2614_v15 = vrot.slane %v686_v7, %v2545_v48  ;;  %v850_v16 = vrot.slane %v2575_v0, %v2525_v40  ;;  %v2619_v17 = vsel %vm427_vm0, %v397_v63, 0.0  ;;  %p2265_p0 = pneg %p2264_p13 }
  0x26   : > { %2139 = vmatpush3.bf16.msra.mxu0 %v2138_v44  ;;  %2167 = vmatpush3.bf16.msra.mxu1 %v2138_v44  ;;  %v485_v18 = vmul.f32 %v2599_v10, %v2509_v33  ;;  %v896_v19 = vrot.slane %v2575_v0, %v2527_v41  ;;  %v900_v20 = vrot.slane %v2575_v0, %v2529_v42  ;;  %v401_v25 = vrot.slane %v2605_v12, 7  ;;  %p2271_p3 = por %p2270_p2, %p2269_p1 }
  0x27   : > { %2141 = vmatprep.subr.bf16.mxu0 %v2140_v50  ;;  %2160 = vmatprep.subr.bf16.mxu1 %v2140_v50  ;;  %v535_v22 = vmul.f32 %v2608_v13, %v2509_v33  ;;  %v537_v23 = vmul.f32 %v2608_v13, %v2512_v34  ;;  %v2636_v24 = vmul.f32 %v2608_v13, %v2596_v9  ;;  %v403_v37 = vrot.slane %v2628_v21, 7 }
  0x28   : > { %v698_v26 = vmul.f32 %v2614_v15, %v2509_v33  ;;  %v700_v27 = vmul.f32 %v2614_v15, %v2512_v34  ;;  %v2645_v28 = vmul.f32 %v2614_v15, %v2596_v9  ;;  %v2648_v29 = vrot.slane %v850_v16, %v2514_v35  ;;  %p2272_p5 = pnand %p2271_p3, %p2265_p0 }
  0x29   : > { %v602_v31 = vrot.slane %v535_v22, 1  ;;  %v603_v32 = vrot.slane %v537_v23, 1  ;;  %v2660_v44 = vrot.slane %v896_v19, %v2527_v41  ;;  %v2667_v47 = vrot.slane %v900_v20, %v2527_v41 }
  0x2a   : > { %2143 = vmatpush3.bf16.msra.mxu0 %v2142_v51  ;;  %2168 = vmatpush3.bf16.msra.mxu1 %v2142_v51  ;;  %v765_v38 = vrot.slane %v698_v26, 2  ;;  %v766_v39 = vrot.slane %v700_v27, 2  ;;  %v862_v43 = vmul.f32 %v2648_v29, %v2586_v5  ;;  %v1058_v50 = vrot.slane %v2575_v0, %v2545_v48  ;;  %v371_v51 = vld [vmem:[%s2543_s10 + $0x58] sm:$0xff] }
  0x2b   : > { %2145 = vmatprep.subr.bf16.mxu0 %v2549_v52  ;;  %2161 = vmatprep.subr.bf16.mxu1 %v2549_v52  ;;  %v604_v45 = vsel %vm598_vm1, %v602_v31, %v603_v32  ;;  %v1062_v56 = vrot.slane %v2575_v0, %v2547_v49  ;;  %v1225_v52 = vrot.slane %v2653_v30, %v2525_v40  ;;  %v405_v6 = vrot.slane %v371_v51, 7 }
  0x2c   : > { %v664_v54 = vadd.f32 %v604_v45, %v485_v18  ;;  %v767_v55 = vsel %vm761_vm2, %v765_v38, %v766_v39  ;;  %v912_v60 = vmul.f32 %v2667_v47, %v2586_v5  ;;  %v914_v61 = vmul.f32 %v2667_v47, %v2596_v9 }
  0x2d   : > { %v2682_v63 = vrot.slane %v1058_v50, %v2545_v48  ;;  %v1271_v1 = vrot.slane %v2653_v30, %v2527_v41  ;;  %v2689_v3 = vrot.slane %v1062_v56, %v2545_v48  ;;  %v2692_v40 = vrot.slane %v1225_v52, %v2514_v35 }
  0x2e   : > { %2147 = vmatpush3.bf16.msra.mxu0 %v2551_v53  ;;  %2169 = vmatpush3.bf16.msra.mxu1 %v2551_v53  ;;  %v827_v2 = vadd.f32 %v767_v55, %v664_v54  ;;  %v978_v7 = vrot.slane %v912_v60, 1  ;;  %v979_v16 = vrot.slane %v914_v61, 1  ;;  %v1275_v18 = vrot.slane %v2653_v30, %v2529_v42  ;;  %v1592_v53 = vld [vmem:[%s3502_s2] sm:$0x3] }
  0x2f   : > { %2149 = vmatprep.subr.bf16.mxu0 %v2560_v57  ;;  %2162 = vmatprep.subr.bf16.mxu1 %v2560_v57  ;;  %v2699_v19 = vrot.slane %v1271_v1, %v2527_v41  ;;  %v1074_v22 = vmul.f32 %v2689_v3, %v2586_v5  ;;  %v1076_v23 = vmul.f32 %v2689_v3, %v2596_v9  ;;  %v2747_v54 = vsel %vm427_vm0, 0.0, %v403_v37 }
  0x30   : > { %v878_v20 = vadd.f32 %v862_v43, %v827_v2  ;;  %v1237_v57 = vmul.f32 %v2692_v40, %v2593_v8  ;;  %v980_v26 = vsel %vm598_vm1, %v978_v7, %v979_v16  ;;  %v2712_v42 = vrot.slane %v1275_v18, %v2527_v41 }
  0x31   : > { %v1433_v27 = vrot.slane %v2653_v30, %v2545_v48  ;;  %v1437_v31 = vrot.slane %v2653_v30, %v2547_v49  ;;  %v1140_v9 = vrot.slane %v1074_v22, 2  ;;  %v1141_v38 = vrot.slane %v1076_v23, 2 }
  0x32   : > { %2151 = vmatpush3.bf16.msra.mxu0 %v2562_v58  ;;  %2170 = vmatpush3.bf16.msra.mxu1 %v2562_v58  ;;  %v1040_v32 = vadd.f32 %v980_v26, %v878_v20  ;;  %v2721_v39 = vrot.slane %v1592_v53, %v2514_v35  ;;  %v1287_v43 = vmul.f32 %v2712_v42, %v2593_v8  ;;  %v2735_v58 = vsel %vm427_vm0, 0.0, %v401_v25 }
  0x33   : > { %2153 = vmatprep.subr.bf16.mxu0 %v2564_v59  ;;  %2163 = vmatprep.subr.bf16.mxu1 %v2564_v59  ;;  %v1289_v49 = vmul.f32 %v2712_v42, %v2619_v17  ;;  %v2730_v45 = vrot.slane %v1433_v27, %v2545_v48  ;;  %3532 = vst [vmem:[#allocation8_spill] sm:$0xff] %v2735_v58  ;;  %v2752_v60 = vsel %vm427_vm0, %v401_v25, 0.0  ;;  %v2761_v61 = vsel %vm427_vm0, 0.0, %v405_v6 }
  0x34   : > { %v1142_v50 = vsel %vm761_vm2, %v1140_v9, %v1141_v38  ;;  %v2739_v51 = vrot.slane %v1437_v31, %v2545_v48  ;;  %v2742_v59 = vrot.slane %v1592_v53, %v2527_v41  ;;  %v1353_v56 = vrot.slane %v1287_v43, 1  ;;  %3533 = vst [vmem:[#allocation9_spill] sm:$0xff] %v2752_v60 }
  0x35   : > { %v1202_v55 = vadd.f32 %v1142_v50, %v1040_v32  ;;  %v1354_v52 = vrot.slane %v1289_v49, 1  ;;  %v2766_v12 = vsel %vm427_vm0, %v403_v37, 0.0  ;;  %v2770_v2 = vsel %vm427_vm0, %v405_v6, 0.0 }
  0x36   : > { %2155 = vmatpush3.bf16.msra.mxu0 %v2583_v4  ;;  %2171 = vmatpush3.bf16.msra.mxu1 %v2583_v4  ;;  %v1449_v41 = vmul.f32 %v2739_v51, %v2593_v8  ;;  %v1451_v48 = vmul.f32 %v2739_v51, %v2619_v17  ;;  %3534 = vst [vmem:[#allocation10_spill] sm:$0xff] %v2766_v12 }
  0x37   : > { %v1253_v25 = vadd.f32 %v1237_v57, %v1202_v55  ;;  %v1355_v1 = vsel %vm598_vm1, %v1353_v56, %v1354_v52  ;;  %v551_v4 = vmul.f32 %v2608_v13, %v2735_v58  ;;  %v553_v18 = vmul.f32 %v2608_v13, %v2752_v60 }
  0x38   : > { %v1515_v7 = vrot.slane %v1449_v41, 2  ;;  %v1516_v16 = vrot.slane %v1451_v48, 2  ;;  %v714_v21 = vmul.f32 %v2614_v15, %v2735_v58  ;;  %v493_v37 = vmul.f32 %v2599_v10, %v2735_v58 }
  0x39   : > { %v1415_v53 = vadd.f32 %v1355_v1, %v1253_v25  ;;  %v626_v20 = vrot.slane %v551_v4, 1  ;;  %v716_v6 = vmul.f32 %v2614_v15, %v2752_v60  ;;  %v627_v23 = vrot.slane %v553_v18, 1 }
  0x3a   : > { %v1517_v22 = vsel %vm761_vm2, %v1515_v7, %v1516_v16  ;;  %v789_v57 = vrot.slane %v714_v21, 2  ;;  %v928_v26 = vmul.f32 %v2667_v47, %v2747_v54  ;;  %v930_v32 = vmul.f32 %v2667_v47, %v2766_v12  ;;  %v360_v7 = vld [vmem:[%s2543_s10] sm:$0xff] }
  0x3b   : > { %v1577_v27 = vadd.f32 %v1517_v22, %v1415_v53  ;;  %v790_v31 = vrot.slane %v716_v6, 2  ;;  %v1090_v9 = vmul.f32 %v2689_v3, %v2747_v54  ;;  %v628_v38 = vsel %vm598_vm1, %v626_v20, %v627_v23 }
  0x3c   : > { %v870_v43 = vmul.f32 %v2648_v29, %v2747_v54  ;;  %v1002_v49 = vrot.slane %v928_v26, 1  ;;  %v1092_v50 = vmul.f32 %v2689_v3, %v2766_v12  ;;  %v672_v56 = vadd.f32 %v628_v38, %v493_v37  ;;  %v362_v37 = vld [vmem:[%s2543_s10 + $0x10] sm:$0xff] }
  0x3d   : > { %v1605_v55 = vadd.f32 %v2742_v59, %v1577_v27  ;;  %v791_v52 = vsel %vm761_vm2, %v789_v57, %v790_v31  ;;  %v1003_v41 = vrot.slane %v930_v32, 1  ;;  %v1164_v48 = vrot.slane %v1090_v9, 2 }
  0x3e   : > { %v1165_v25 = vrot.slane %v1092_v50, 2  ;;  %v1303_v1 = vmul.f32 %v2712_v42, %v2761_v61  ;;  %v1305_v4 = vmul.f32 %v2712_v42, %v2770_v2  ;;  %v835_v21 = vadd.f32 %v791_v52, %v672_v56 }
  0x3f   : > { %v2801_v16 = vmul.f32 0.5, %v1605_v55  ;;  %v1637_v18 = vmul.f32 0.70710677, %v1605_v55  ;;  %v1245_v53 = vmul.f32 %v2692_v40, %v2761_v61  ;;  %v1004_v20 = vsel %vm598_vm1, %v1002_v49, %v1003_v41 }
  0x40   : > { %v1377_v6 = vrot.slane %v1303_v1, 1  ;;  %v1378_v22 = vrot.slane %v1305_v4, 1  ;;  %v1465_v23 = vmul.f32 %v2739_v51, %v2761_v61  ;;  %v886_v57 = vadd.f32 %v870_v43, %v835_v21 }
  0x41   : > { %2230 = verf.f32 %v1637_v18  ;;  %v1467_v26 = vmul.f32 %v2739_v51, %v2770_v2  ;;  %v394_v27 = vrot.slane %v360_v7, 7  ;;  %v1166_v31 = vsel %vm761_vm2, %v1164_v48, %v1165_v25 }
  0x42   : > { %v1539_v32 = vrot.slane %v1465_v23, 2  ;;  %v396_v9 = vrot.slane %v362_v37, 7  ;;  %v469_v38 = vrot.slane %v2570_v62, %v2514_v35  ;;  %v1048_v50 = vadd.f32 %v1004_v20, %v886_v57 }
  0x43   : > { %v1379_v49 = vsel %vm598_vm1, %v1377_v6, %v1378_v22  ;;  %v1540_v55 = vrot.slane %v1467_v26, 2  ;;  %v2816_v56 = vsel %vm427_vm0, 0.0, %v394_v27  ;;  %v2822_v52 = vsel %vm427_vm0, %v394_v27, 0.0 }
  0x44   : > { %v2819_v43 = vsel %vm427_vm0, 0.0, %v396_v9  ;;  %v2825_v41 = vrot.slane %v469_v38, %v2514_v35  ;;  %v534_v48 = vmul.f32 %v2602_v11, %v2509_v33  ;;  %v1210_v62 = vadd.f32 %v1166_v31, %v1048_v50 }
  0x45   : > { %v1541_v25 = vsel %vm761_vm2, %v1539_v32, %v1540_v55  ;;  %v536_v1 = vmul.f32 %v2602_v11, %v2512_v34  ;;  %v697_v4 = vmul.f32 %v2611_v14, %v2509_v33  ;;  %v699_v21 = vmul.f32 %v2611_v14, %v2512_v34 }
  0x46   : > { %v484_v7 = vmul.f32 %v2825_v41, %v2509_v33  ;;  %v599_v18 = vrot.slane %v534_v48, 1  ;;  %v846_v37 = vrot.slane %v2575_v0, %v2514_v35  ;;  %v1261_v20 = vadd.f32 %v1245_v53, %v1210_v62 }
  0x47   : > { %v600_v6 = vrot.slane %v536_v1, 1  ;;  %v762_v22 = vrot.slane %v697_v4, 2  ;;  %v911_v23 = vmul.f32 %v2660_v44, %v2816_v56  ;;  %v763_v57 = vrot.slane %v699_v21, 2 }
  0x48   : > { %v2843_v26 = vrot.slane %v846_v37, %v2514_v35  ;;  %v913_v27 = vmul.f32 %v2660_v44, %v2822_v52  ;;  %v1073_v31 = vmul.f32 %v2682_v63, %v2816_v56  ;;  %v1423_v32 = vadd.f32 %v1379_v49, %v1261_v20 }
  0x49   : > { %v601_v38 = vsel %vm598_vm1, %v599_v18, %v600_v6  ;;  %v975_v0 = vrot.slane %v911_v23, 1  ;;  %v1075_v53 = vmul.f32 %v2682_v63, %v2822_v52  ;;  %v764_v55 = vsel %vm761_vm2, %v762_v22, %v763_v57 }
  0x4a   : > { %v663_v50 = vadd.f32 %v601_v38, %v484_v7  ;;  %v861_v48 = vmul.f32 %v2843_v26, %v2816_v56  ;;  %v976_v62 = vrot.slane %v913_v27, 1  ;;  %v1585_v4 = vadd.f32 %v1541_v25, %v1423_v32  ;;  %v366_v27 = vld [vmem:[%s2543_s10 + $0x30] sm:$0xff]  ;;  %v368_v38 = vld [vmem:[%s2543_s10 + $0x40] sm:$0xff] }
  0x4b   : > { %v2231_v1 = vpop.eup %2230  ;;  %v1137_v21 = vrot.slane %v1073_v31, 2  ;;  %v1138_v37 = vrot.slane %v1075_v53, 2  ;;  %v1221_v49 = vrot.slane %v2653_v30, %v2514_v35  ;;  %v2858_v20 = vsel %vm427_vm0, %v396_v9, 0.0  ;;  %v370_v53 = vld [vmem:[%s2543_s10 + $0x50] sm:$0xff] }
  0x4c   : > { %v1669_v18 = vadd.f32 1.0, %v2231_v1  ;;  %v826_v7 = vadd.f32 %v764_v55, %v663_v50  ;;  %v1286_v6 = vmul.f32 %v2699_v19, %v2819_v43  ;;  %v1613_v22 = vadd.f32 %v2742_v59, %v1585_v4 }
  0x4d   : > { %v977_v23 = vsel %vm598_vm1, %v975_v0, %v976_v62  ;;  %v2865_v25 = vrot.slane %v1221_v49, %v2514_v35  ;;  %v1288_v57 = vmul.f32 %v2699_v19, %v2858_v20  ;;  %v1139_v9 = vsel %vm761_vm2, %v1137_v21, %v1138_v37 }
  0x4e   : > { %v1685_v30 = vmul.f32 %v1669_v18, %v2801_v16  ;;  %v877_v31 = vadd.f32 %v861_v48, %v826_v7  ;;  %v1448_v32 = vmul.f32 %v2730_v45, %v2819_v43  ;;  %v1645_v50 = vmul.f32 0.70710677, %v1613_v22 }
  0x4f   : > { %v1236_v0 = vmul.f32 %v2865_v25, %v2819_v43  ;;  %v1350_v35 = vrot.slane %v1286_v6, 1  ;;  %v1351_v55 = vrot.slane %v1288_v57, 1  ;;  %v1450_v1 = vmul.f32 %v2730_v45, %v2858_v20 }
  0x50   : > { %1804 = vmatprep.mubr.f32.mxu0 %v1685_v30  ;;  %v1039_v62 = vadd.f32 %v977_v23, %v877_v31  ;;  %v1512_v16 = vrot.slane %v1448_v32, 2  ;;  %v400_v48 = vrot.slane %v366_v27, 7  ;;  %v1629_v4 = vmul.f32 0.5, %v1613_v22 }
  0x51   : > { %2232 = verf.f32 %v1645_v50  ;;  %v402_v21 = vrot.slane %v368_v38, 7  ;;  %v404_v37 = vrot.slane %v370_v53, 7  ;;  %v1513_v18 = vrot.slane %v1450_v1, 2 }
  0x52   : > { %v1201_v49 = vadd.f32 %v1139_v9, %v1039_v62  ;;  %v2881_v7 = vsel %vm427_vm0, 0.0, %v400_v48  ;;  %v2884_v46 = vsel %vm427_vm0, %v400_v48, 0.0  ;;  %v1352_v6 = vsel %vm598_vm1, %v1350_v35, %v1351_v55 }
  0x53   : > { %3535 = vst [vmem:[#allocation11_spill] sm:$0xff] %v2881_v7  ;;  %3536 = vst [vmem:[#allocation12_spill] sm:$0xff] %v2884_v46  ;;  %v2888_v23 = vsel %vm427_vm0, 0.0, %v402_v21  ;;  %v2891_v57 = vsel %vm427_vm0, 0.0, %v404_v37  ;;  %v2894_v22 = vsel %vm427_vm0, %v402_v21, 0.0  ;;  %v1514_v30 = vsel %vm761_vm2, %v1512_v16, %v1513_v18 }
  0x54   : > { %3537 = vst [vmem:[#allocation13_spill] sm:$0xff] %v2888_v23  ;;  %3538 = vst [vmem:[#allocation14_spill] sm:$0xff] %v2891_v57  ;;  %v1252_v27 = vadd.f32 %v1236_v0, %v1201_v49  ;;  %v2898_v31 = vsel %vm427_vm0, %v404_v37, 0.0  ;;  %v550_v9 = vmul.f32 %v2602_v11, %v2881_v7  ;;  %v492_v32 = vmul.f32 %v2825_v41, %v2881_v7 }
  0x55   : > { %3539 = vst [vmem:[#allocation15_spill] sm:$0xff] %v2894_v22  ;;  %v552_v38 = vmul.f32 %v2602_v11, %v2884_v46  ;;  %v713_v53 = vmul.f32 %v2611_v14, %v2881_v7  ;;  %v715_v50 = vmul.f32 %v2611_v14, %v2884_v46  ;;  %v927_v55 = vmul.f32 %v2660_v44, %v2888_v23 }
  0x56   : > { %v1414_v0 = vadd.f32 %v1352_v6, %v1252_v27  ;;  %v623_v35 = vrot.slane %v550_v9, 1  ;;  %v929_v62 = vmul.f32 %v2660_v44, %v2894_v22  ;;  %v1089_v21 = vmul.f32 %v2682_v63, %v2888_v23 }
  0x57   : > { %v624_v1 = vrot.slane %v552_v38, 1  ;;  %v786_v16 = vrot.slane %v713_v53, 2  ;;  %v787_v48 = vrot.slane %v715_v50, 2  ;;  %v999_v49 = vrot.slane %v927_v55, 1 }
  0x58   : > { %v1576_v37 = vadd.f32 %v1514_v30, %v1414_v0  ;;  %v1000_v18 = vrot.slane %v929_v62, 1  ;;  %v1091_v36 = vmul.f32 %v2682_v63, %v2894_v22  ;;  %v869_v9 = vmul.f32 %v2843_v26, %v2888_v23 }
  0x59   : > { %v625_v6 = vsel %vm598_vm1, %v623_v35, %v624_v1  ;;  %v788_v27 = vsel %vm761_vm2, %v786_v16, %v787_v48  ;;  %v1161_v38 = vrot.slane %v1089_v21, 2  ;;  %v1244_v30 = vmul.f32 %v2865_v25, %v2891_v57  ;;  %v365_v21 = vld [vmem:[%s2543_s10 + $0x28] sm:$0xff] }
  0x5a   : > { %v1604_v53 = vadd.f32 %v2721_v39, %v1576_v37  ;;  %v671_v50 = vadd.f32 %v625_v6, %v492_v32  ;;  %v1162_v34 = vrot.slane %v1091_v36, 2  ;;  %v1302_v55 = vmul.f32 %v2699_v19, %v2891_v57 }
  0x5b   : > { %v2233_v0 = vpop.eup %2232  ;;  %v1304_v35 = vmul.f32 %v2699_v19, %v2898_v31  ;;  %v1464_v62 = vmul.f32 %v2730_v45, %v2891_v57  ;;  %v1466_v1 = vmul.f32 %v2730_v45, %v2898_v31  ;;  %v1001_v36 = vsel %vm598_vm1, %v999_v49, %v1000_v18 }
  0x5c   : > { %v1677_v16 = vadd.f32 1.0, %v2233_v0  ;;  %v1636_v48 = vmul.f32 0.70710677, %v1604_v53  ;;  %v834_v32 = vadd.f32 %v788_v27, %v671_v50  ;;  %v1620_v37 = vmul.f32 0.5, %v1604_v53 }
  0x5d   : > { %v1374_v6 = vrot.slane %v1302_v55, 1  ;;  %v1375_v33 = vrot.slane %v1304_v35, 1  ;;  %v1536_v46 = vrot.slane %v1464_v62, 2  ;;  %v1537_v58 = vrot.slane %v1466_v1, 2 }
  0x5e   : > { %v1693_v7 = vmul.f32 %v1677_v16, %v1629_v4  ;;  %2234 = verf.f32 %v1636_v48  ;;  %v885_v60 = vadd.f32 %v869_v9, %v834_v32  ;;  %v1163_v22 = vsel %vm761_vm2, %v1161_v38, %v1162_v34 }
  0x5f   : > { %v1376_v57 = vsel %vm598_vm1, %v1374_v6, %v1375_v33  ;;  %v399_v23 = vrot.slane %v365_v21, 7  ;;  %v539_v0 = vmul.f32 %v2608_v13, %v2586_v5  ;;  %v1538_v49 = vsel %vm761_vm2, %v1536_v46, %v1537_v58  ;;  %v373_v21 = vld [vmem:[%s2543_s10 + $0x68] sm:$0xff] }
  0x60   : > { %1824 = vmatprep.mubr.f32.mxu1 %v1693_v7  ;;  %v1047_v27 = vadd.f32 %v1001_v36, %v885_v60  ;;  %v487_v18 = vmul.f32 %v2599_v10, %v2586_v5  ;;  %v702_v4 = vmul.f32 %v2614_v15, %v2586_v5  ;;  %v864_v33 = vmul.f32 %v2648_v29, %v2593_v8 }
  0x61   : > { %v2945_v9 = vsel %vm427_vm0, 0.0, %v399_v23  ;;  %v608_v34 = vrot.slane %v539_v0, 1  ;;  %v916_v38 = vmul.f32 %v2667_v47, %v2593_v8  ;;  %v918_v46 = vmul.f32 %v2667_v47, %v2619_v17 }
  0x62   : > { %v1209_v7 = vadd.f32 %v1163_v22, %v1047_v27  ;;  %v771_v60 = vrot.slane %v702_v4, 2  ;;  %v1078_v58 = vmul.f32 %v2689_v3, %v2593_v8  ;;  %v2956_v5 = vsel %vm427_vm0, %v399_v23, 0.0 }
  0x63   : > { %v3540_v53 = vrot.slane %v2636_v24, 1  ;;  %v984_v55 = vrot.slane %v916_v38, 1  ;;  %v1080_v35 = vmul.f32 %v2689_v3, %v2619_v17  ;;  %v3541_v1 = vrot.slane %v2645_v28, 2 }
  0x64   : > { %v1260_v22 = vadd.f32 %v1244_v30, %v1209_v7  ;;  %v985_v48 = vrot.slane %v918_v46, 1  ;;  %v1146_v32 = vrot.slane %v1078_v58, 2  ;;  %v1291_v23 = vmul.f32 %v2712_v42, %v2945_v9 }
  0x65   : > { %v610_v50 = vsel %vm598_vm1, %v608_v34, %v3540_v53  ;;  %v773_v16 = vsel %vm761_vm2, %v771_v60, %v3541_v1  ;;  %v1147_v36 = vrot.slane %v1080_v35, 2  ;;  %v1293_v24 = vmul.f32 %v2712_v42, %v2956_v5 }
  0x66   : > { %v666_v62 = vadd.f32 %v610_v50, %v487_v18  ;;  %v1422_v6 = vadd.f32 %v1376_v57, %v1260_v22  ;;  %v1239_v30 = vmul.f32 %v2692_v40, %v2945_v9  ;;  %v1453_v28 = vmul.f32 %v2739_v51, %v2945_v9 }
  0x67   : > { %v986_v27 = vsel %vm598_vm1, %v984_v55, %v985_v48  ;;  %v1359_v18 = vrot.slane %v1291_v23, 1  ;;  %v1360_v4 = vrot.slane %v1293_v24, 1  ;;  %v1455_v34 = vmul.f32 %v2739_v51, %v2956_v5 }
  0x68   : > { %v829_v0 = vadd.f32 %v773_v16, %v666_v62  ;;  %v2235_v38 = vpop.eup %2234  ;;  %v1584_v7 = vadd.f32 %v1538_v49, %v1422_v6  ;;  %v1521_v46 = vrot.slane %v1453_v28, 2  ;;  %v407_v58 = vrot.slane %v373_v21, 7 }
  0x69   : > { %v1668_v57 = vadd.f32 1.0, %v2235_v38  ;;  %v1148_v53 = vsel %vm761_vm2, %v1146_v32, %v1147_v36  ;;  %v1361_v50 = vsel %vm598_vm1, %v1359_v18, %v1360_v4  ;;  %v1522_v35 = vrot.slane %v1455_v34, 2 }
  0x6a   : > { %v880_v60 = vadd.f32 %v864_v33, %v829_v0  ;;  %v1612_v22 = vadd.f32 %v2721_v39, %v1584_v7  ;;  %v2982_v55 = vsel %vm427_vm0, 0.0, %v407_v58  ;;  %v495_v1 = vmul.f32 %v2599_v10, %v2747_v54 }
  0x6b   : > { %v1684_v16 = vmul.f32 %v1668_v57, %v1620_v37  ;;  %v2987_v49 = vsel %vm427_vm0, %v407_v58, 0.0  ;;  %v555_v33 = vmul.f32 %v2608_v13, %v2747_v54  ;;  %v557_v48 = vmul.f32 %v2608_v13, %v2766_v12 }
  0x6c   : > { %v1042_v62 = vadd.f32 %v986_v27, %v880_v60  ;;  %v1644_v32 = vmul.f32 0.70710677, %v1612_v22  ;;  %v1523_v23 = vsel %vm761_vm2, %v1521_v46, %v1522_v35  ;;  %v718_v24 = vmul.f32 %v2614_v15, %v2747_v54 }
  0x6d   : > { %1805 = vmatmul.mubr.f32.vlgmr.msra.gmra.mrb[0].mxu0 %v1684_v16  ;;  %v632_v21 = vrot.slane %v555_v33, 1  ;;  %v633_v6 = vrot.slane %v557_v48, 1  ;;  %v720_v37 = vmul.f32 %v2614_v15, %v2766_v12  ;;  %v872_v0 = vmul.f32 %v2648_v29, %v2761_v61 }
  0x6e   : > { %v1204_v36 = vadd.f32 %v1148_v53, %v1042_v62  ;;  %2236 = verf.f32 %v1644_v32  ;;  %v795_v27 = vrot.slane %v718_v24, 2  ;;  %v932_v18 = vmul.f32 %v2667_v47, %v2761_v61 }
  0x6f   : > { %v634_v4 = vsel %vm598_vm1, %v632_v21, %v633_v6  ;;  %v796_v34 = vrot.slane %v720_v37, 2  ;;  %v934_v38 = vmul.f32 %v2667_v47, %v2770_v2  ;;  %v1094_v7 = vmul.f32 %v2689_v3, %v2761_v61 }
  0x70   : > { %v1255_v28 = vadd.f32 %v1239_v30, %v1204_v36  ;;  %v674_v46 = vadd.f32 %v634_v4, %v495_v1  ;;  %v1008_v58 = vrot.slane %v932_v18, 1  ;;  %v1096_v30 = vmul.f32 %v2689_v3, %v2770_v2  ;;  %v364_v36 = vld [vmem:[%s2543_s10 + $0x20] sm:$0xff] }
  0x71   : > { %v1628_v57 = vmul.f32 0.5, %v1612_v22  ;;  %v797_v53 = vsel %vm761_vm2, %v795_v27, %v796_v34  ;;  %v1009_v35 = vrot.slane %v934_v38, 1  ;;  %v1170_v62 = vrot.slane %v1094_v7, 2 }
  0x72   : > { %v1417_v60 = vadd.f32 %v1361_v50, %v1255_v28  ;;  %v837_v33 = vadd.f32 %v797_v53, %v674_v46  ;;  %v1171_v48 = vrot.slane %v1096_v30, 2  ;;  %v1307_v32 = vmul.f32 %v2712_v42, %v2982_v55 }
  0x73   : > { %v1010_v24 = vsel %vm598_vm1, %v1008_v58, %v1009_v35  ;;  %v1309_v50 = vmul.f32 %v2712_v42, %v2987_v49  ;;  %v1469_v1 = vmul.f32 %v2739_v51, %v2982_v55  ;;  %v1471_v22 = vmul.f32 %v2739_v51, %v2987_v49 }
  0x74   : > { %v1579_v16 = vadd.f32 %v1523_v23, %v1417_v60  ;;  %v888_v23 = vadd.f32 %v872_v0, %v837_v33  ;;  %v1172_v6 = vsel %vm761_vm2, %v1170_v62, %v1171_v48  ;;  %v1383_v37 = vrot.slane %v1307_v32, 1 }
  0x75   : > { %v1384_v28 = vrot.slane %v1309_v50, 1  ;;  %v1545_v27 = vrot.slane %v1469_v1, 2  ;;  %v1546_v18 = vrot.slane %v1471_v22, 2  ;;  %v398_v4 = vrot.slane %v364_v36, 7 }
  0x76   : > { %v1607_v21 = vadd.f32 %v2742_v59, %v1579_v16  ;;  %v1050_v7 = vadd.f32 %v1010_v24, %v888_v23  ;;  %v1247_v60 = vmul.f32 %v2692_v40, %v2982_v55  ;;  %v486_v30 = vmul.f32 %v2825_v41, %v2816_v56 }
  0x77   : > { %v1385_v46 = vsel %vm598_vm1, %v1383_v37, %v1384_v28  ;;  %v1547_v58 = vsel %vm761_vm2, %v1545_v27, %v1546_v18  ;;  %v3029_v0 = vsel %vm427_vm0, 0.0, %v398_v4  ;;  %v538_v62 = vmul.f32 %v2602_v11, %v2816_v56 }
  0x78   : > { %v3022_v34 = vmul.f32 0.5, %v1607_v21  ;;  %v1639_v38 = vmul.f32 0.70710677, %v1607_v21  ;;  %v2237_v53 = vpop.eup %2236  ;;  %v1212_v35 = vadd.f32 %v1172_v6, %v1050_v7  ;;  %v540_v16 = vmul.f32 %v2602_v11, %v2822_v52 }
  0x79   : > { %v1676_v33 = vadd.f32 1.0, %v2237_v53  ;;  %v701_v48 = vmul.f32 %v2611_v14, %v2816_v56  ;;  %v703_v32 = vmul.f32 %v2611_v14, %v2822_v52  ;;  %v863_v36 = vmul.f32 %v2843_v26, %v2819_v43 }
  0x7a   : > { %2238 = verf.f32 %v1639_v38  ;;  %v1263_v24 = vadd.f32 %v1247_v60, %v1212_v35  ;;  %v605_v50 = vrot.slane %v538_v62, 1  ;;  %v606_v1 = vrot.slane %v540_v16, 1  ;;  %v372_v62 = vld [vmem:[%s2543_s10 + $0x60] sm:$0xff] }
  0x7b   : > { %v915_v22 = vmul.f32 %v2660_v44, %v2819_v43  ;;  %v1692_v21 = vmul.f32 %v1676_v33, %v1628_v57  ;;  %v768_v23 = vrot.slane %v701_v48, 2  ;;  %v769_v6 = vrot.slane %v703_v32, 2 }
  0x7c   : > { %v917_v37 = vmul.f32 %v2660_v44, %v2858_v20  ;;  %v1425_v56 = vadd.f32 %v1385_v46, %v1263_v24  ;;  %v607_v28 = vsel %vm598_vm1, %v605_v50, %v606_v1  ;;  %v1077_v27 = vmul.f32 %v2682_v63, %v2819_v43 }
  0x7d   : > { %v981_v52 = vrot.slane %v915_v22, 1  ;;  %1825 = vmatmul.mubr.f32.vlgmr.msra.gmra.mrb[0].mxu1 %v1692_v21  ;;  %v665_v18 = vadd.f32 %v607_v28, %v486_v30  ;;  %v770_v38 = vsel %vm761_vm2, %v768_v23, %v769_v6  ;;  %v1079_v57 = vmul.f32 %v2682_v63, %v2858_v20 }
  0x7e   : > { %v982_v7 = vrot.slane %v917_v37, 1  ;;  %v1587_v60 = vadd.f32 %v1547_v58, %v1425_v56  ;;  %v3054_v53 = vsel %vm427_vm0, %v398_v4, 0.0  ;;  %v1143_v35 = vrot.slane %v1077_v27, 2 }
  0x7f   : > { %v1290_v46 = vmul.f32 %v2699_v19, %v3029_v0  ;;  %v828_v16 = vadd.f32 %v770_v38, %v665_v18  ;;  %v1144_v48 = vrot.slane %v1079_v57, 2  ;;  %v1292_v30 = vmul.f32 %v2699_v19, %v3054_v53 }
  0x80   : > { %v983_v33 = vsel %vm598_vm1, %v981_v52, %v982_v7  ;;  %v1615_v32 = vadd.f32 %v2742_v59, %v1587_v60  ;;  %v1452_v58 = vmul.f32 %v2730_v45, %v3029_v0  ;;  %v1454_v4 = vmul.f32 %v2730_v45, %v3054_v53 }
  0x81   : > { %v1356_v24 = vrot.slane %v1290_v46, 1  ;;  %v879_v50 = vadd.f32 %v863_v36, %v828_v16  ;;  %v1238_v1 = vmul.f32 %v2865_v25, %v3029_v0  ;;  %v1357_v22 = vrot.slane %v1292_v30, 1  ;;  %v3543_v16 = vld [vmem:[#allocation15_spill] sm:$0xff] }
  0x82   : > { %v406_v21 = vrot.slane %v372_v62, 7  ;;  %v1647_v6 = vmul.f32 0.70710677, %v1615_v32  ;;  %v1145_v37 = vsel %vm761_vm2, %v1143_v35, %v1144_v48  ;;  %v1518_v56 = vrot.slane %v1452_v58, 2  ;;  %v3542_v35 = vld [vmem:[#allocation13_spill] sm:$0xff] }
  0x83   : > { %v1519_v28 = vrot.slane %v1454_v4, 2  ;;  %v1631_v27 = vmul.f32 0.5, %v1615_v32  ;;  %v1041_v18 = vadd.f32 %v983_v33, %v879_v50  ;;  %v1358_v38 = vsel %vm598_vm1, %v1356_v24, %v1357_v22  ;;  %v3544_v24 = vld [vmem:[#allocation14_spill] sm:$0xff] }
  0x84   : > { %v2239_v23 = vpop.eup %2238  ;;  %2240 = verf.f32 %v1647_v6  ;;  %v3073_v36 = vsel %vm427_vm0, 0.0, %v406_v21  ;;  %v3076_v57 = vsel %vm427_vm0, %v406_v21, 0.0  ;;  %v554_v62 = vmul.f32 %v2602_v11, %v3542_v35 }
  0x85   : > { %v1671_v52 = vadd.f32 1.0, %v2239_v23  ;;  %v1520_v7 = vsel %vm761_vm2, %v1518_v56, %v1519_v28  ;;  %v1203_v46 = vadd.f32 %v1145_v37, %v1041_v18  ;;  %v556_v33 = vmul.f32 %v2602_v11, %v3543_v16 }
  0x86   : > { %v494_v48 = vmul.f32 %v2825_v41, %v3542_v35  ;;  %v717_v30 = vmul.f32 %v2611_v14, %v3542_v35  ;;  %v719_v32 = vmul.f32 %v2611_v14, %v3543_v16  ;;  %v931_v58 = vmul.f32 %v2660_v44, %v3544_v24 }
  0x87   : > { %v1687_v60 = vmul.f32 %v1671_v52, %v3022_v34  ;;  %v1254_v34 = vadd.f32 %v1238_v1, %v1203_v46  ;;  %v629_v4 = vrot.slane %v554_v62, 1  ;;  %v630_v50 = vrot.slane %v556_v33, 1 }
  0x88   : > { %v933_v22 = vmul.f32 %v2660_v44, %v2898_v31  ;;  %v792_v21 = vrot.slane %v717_v30, 2  ;;  %v793_v23 = vrot.slane %v719_v32, 2  ;;  %v1005_v6 = vrot.slane %v931_v58, 1 }
  0x89   : > { %1809 = vmatprep.mubr.f32.mxu0 %v1687_v60  ;;  %v1093_v37 = vmul.f32 %v2682_v63, %v3544_v24  ;;  %v1416_v56 = vadd.f32 %v1358_v38, %v1254_v34  ;;  %v631_v28 = vsel %vm598_vm1, %v629_v4, %v630_v50  ;;  %v1095_v18 = vmul.f32 %v2682_v63, %v2898_v31 }
  0x8a   : > { %v1006_v52 = vrot.slane %v933_v22, 1  ;;  %v673_v60 = vadd.f32 %v631_v28, %v494_v48  ;;  %v794_v1 = vsel %vm761_vm2, %v792_v21, %v793_v23  ;;  %v871_v46 = vmul.f32 %v2843_v26, %v3544_v24 }
  0x8b   : > { %v1167_v62 = vrot.slane %v1093_v37, 2  ;;  %v1578_v33 = vadd.f32 %v1520_v7, %v1416_v56  ;;  %v1168_v30 = vrot.slane %v1095_v18, 2  ;;  %v1246_v32 = vmul.f32 %v2865_v25, %v3073_v36 }
  0x8c   : > { %v1306_v38 = vmul.f32 %v2699_v19, %v3073_v36  ;;  %v836_v58 = vadd.f32 %v794_v1, %v673_v60  ;;  %v1308_v34 = vmul.f32 %v2699_v19, %v3076_v57  ;;  %v1468_v48 = vmul.f32 %v2730_v45, %v3073_v36 }
  0x8d   : > { %v1470_v4 = vmul.f32 %v2730_v45, %v3076_v57  ;;  %v1606_v50 = vadd.f32 %v2721_v39, %v1578_v33  ;;  %v1007_v7 = vsel %vm598_vm1, %v1005_v6, %v1006_v52  ;;  %v1169_v22 = vsel %vm761_vm2, %v1167_v62, %v1168_v30 }
  0x8e   : > { %v1380_v21 = vrot.slane %v1306_v38, 1  ;;  %v2241_v23 = vpop.eup %2240  ;;  %v887_v37 = vadd.f32 %v871_v46, %v836_v58  ;;  %v1381_v56 = vrot.slane %v1308_v34, 1  ;;  %v1542_v28 = vrot.slane %v1468_v48, 2 }
  0x8f   : > { %v1543_v18 = vrot.slane %v1470_v4, 2  ;;  %v1679_v60 = vadd.f32 1.0, %v2241_v23  ;;  %v1638_v1 = vmul.f32 0.70710677, %v1606_v50  ;;  %v489_v16 = vmul.f32 %v2599_v10, %v2593_v8 }
  0x90   : > { %v543_v35 = vmul.f32 %v2608_v13, %v2593_v8  ;;  %v1622_v12 = vmul.f32 0.5, %v1606_v50  ;;  %v1049_v33 = vadd.f32 %v1007_v7, %v887_v37  ;;  %v1382_v6 = vsel %vm598_vm1, %v1380_v21, %v1381_v56 }
  0x91   : > { %v545_v52 = vmul.f32 %v2608_v13, %v2619_v17  ;;  %v1695_v62 = vmul.f32 %v1679_v60, %v1631_v27  ;;  %2242 = verf.f32 %v1638_v1  ;;  %v706_v30 = vmul.f32 %v2614_v15, %v2593_v8 }
  0x92   : > { %v614_v46 = vrot.slane %v543_v35, 1  ;;  %v1211_v38 = vadd.f32 %v1169_v22, %v1049_v33  ;;  %v1544_v58 = vsel %vm761_vm2, %v1542_v28, %v1543_v18  ;;  %v708_v48 = vmul.f32 %v2614_v15, %v2619_v17  ;;  %v375_v33 = vld [vmem:[%s2543_s10 + $0x78] sm:$0xff] }
  0x93   : > { %v615_v34 = vrot.slane %v545_v52, 1  ;;  %1829 = vmatprep.mubr.f32.mxu1 %v1695_v62  ;;  %v777_v4 = vrot.slane %v706_v30, 2  ;;  %v920_v50 = vmul.f32 %v2667_v47, %v2945_v9  ;;  %v922_v27 = vmul.f32 %v2667_v47, %v2956_v5  ;;  %v3546_v30 = vld [vmem:[#allocation9_spill] sm:$0xff] }
  0x94   : > { %v1082_v35 = vmul.f32 %v2689_v3, %v2945_v9  ;;  %v1262_v8 = vadd.f32 %v1246_v32, %v1211_v38  ;;  %v778_v22 = vrot.slane %v708_v48, 2  ;;  %v1084_v21 = vmul.f32 %v2689_v3, %v2956_v5  ;;  %v3545_v32 = vld [vmem:[#allocation8_spill] sm:$0xff] }
  0x95   : > { %v616_v7 = vsel %vm598_vm1, %v614_v46, %v615_v34  ;;  %v866_v23 = vmul.f32 %v2648_v29, %v2945_v9  ;;  %v990_v37 = vrot.slane %v920_v50, 1  ;;  %v991_v56 = vrot.slane %v922_v27, 1 }
  0x96   : > { %v668_v17 = vadd.f32 %v616_v7, %v489_v16  ;;  %v1424_v28 = vadd.f32 %v1382_v6, %v1262_v8  ;;  %v779_v18 = vsel %vm761_vm2, %v777_v4, %v778_v22  ;;  %v1152_v60 = vrot.slane %v1082_v35, 2 }
  0x97   : > { %v1153_v1 = vrot.slane %v1084_v21, 2  ;;  %v1241_v62 = vmul.f32 %v2692_v40, %v3545_v32  ;;  %v1295_v46 = vmul.f32 %v2712_v42, %v3545_v32  ;;  %v1297_v16 = vmul.f32 %v2712_v42, %v3546_v30 }
  0x98   : > { %v831_v52 = vadd.f32 %v779_v18, %v668_v17  ;;  %v1586_v38 = vadd.f32 %v1544_v58, %v1424_v28  ;;  %v992_v34 = vsel %vm598_vm1, %v990_v37, %v991_v56  ;;  %v1457_v6 = vmul.f32 %v2739_v51, %v3545_v32 }
  0x99   : > { %v1459_v48 = vmul.f32 %v2739_v51, %v3546_v30  ;;  %v1365_v50 = vrot.slane %v1295_v46, 1  ;;  %v1366_v27 = vrot.slane %v1297_v16, 1  ;;  %v409_v35 = vrot.slane %v375_v33, 7 }
  0x9a   : > { %v882_v4 = vadd.f32 %v866_v23, %v831_v52  ;;  %v1614_v8 = vadd.f32 %v2721_v39, %v1586_v38  ;;  %v1154_v7 = vsel %vm761_vm2, %v1152_v60, %v1153_v1  ;;  %v1527_v22 = vrot.slane %v1457_v6, 2 }
  0x9b   : > { %v1528_v21 = vrot.slane %v1459_v48, 2  ;;  %v2243_v17 = vpop.eup %2242  ;;  %v1367_v37 = vsel %vm598_vm1, %v1365_v50, %v1366_v27  ;;  %v3154_v56 = vsel %vm427_vm0, 0.0, %v409_v35  ;;  %v497_v28 = vmul.f32 %v2599_v10, %v2761_v61 }
  0x9c   : > { %v1044_v58 = vadd.f32 %v992_v34, %v882_v4  ;;  %v1670_v23 = vadd.f32 1.0, %v2243_v17  ;;  %v1630_v18 = vmul.f32 0.5, %v1614_v8  ;;  %v1646_v52 = vmul.f32 0.70710677, %v1614_v8 }
  0x9d   : > { %v3159_v33 = vsel %vm427_vm0, %v409_v35, 0.0  ;;  %v559_v60 = vmul.f32 %v2608_v13, %v2761_v61  ;;  %v561_v1 = vmul.f32 %v2608_v13, %v2770_v2  ;;  %v722_v16 = vmul.f32 %v2614_v15, %v2761_v61 }
  0x9e   : > { %v1206_v46 = vadd.f32 %v1154_v7, %v1044_v58  ;;  %v1686_v38 = vmul.f32 %v1670_v23, %v1622_v12  ;;  %2244 = verf.f32 %v1646_v52  ;;  %v1529_v34 = vsel %vm761_vm2, %v1527_v22, %v1528_v21 }
  0x9f   : > { %v724_v6 = vmul.f32 %v2614_v15, %v2770_v2  ;;  %v638_v4 = vrot.slane %v559_v60, 1  ;;  %v639_v50 = vrot.slane %v561_v1, 1  ;;  %v801_v27 = vrot.slane %v722_v16, 2 }
  0xa0   : > { %v1257_v48 = vadd.f32 %v1241_v62, %v1206_v46  ;;  %1810 = vmatmul.mubr.f32.gmra.mrb[2].mxu0 %v1686_v38  ;;  %v936_v8 = vmul.f32 %v2667_v47, %v2982_v55  ;;  %v938_v7 = vmul.f32 %v2667_v47, %v2987_v49  ;;  %v1098_v61 = vmul.f32 %v2689_v3, %v2982_v55 }
  0xa1   : > { %v802_v35 = vrot.slane %v724_v6, 2  ;;  %v640_v22 = vsel %vm598_vm1, %v638_v4, %v639_v50  ;;  %v874_v2 = vmul.f32 %v2648_v29, %v2982_v55  ;;  %v1100_v62 = vmul.f32 %v2689_v3, %v2987_v49 }
  0xa2   : > { %v1419_v12 = vadd.f32 %v1367_v37, %v1257_v48  ;;  %v676_v21 = vadd.f32 %v640_v22, %v497_v28  ;;  %v1014_v58 = vrot.slane %v936_v8, 1  ;;  %v1015_v23 = vrot.slane %v938_v7, 1 }
  0xa3   : > { %v803_v17 = vsel %vm761_vm2, %v801_v27, %v802_v35  ;;  %v1176_v46 = vrot.slane %v1098_v61, 2  ;;  %v1177_v60 = vrot.slane %v1100_v62, 2  ;;  %v1311_v1 = vmul.f32 %v2712_v42, %v3154_v56 }
  0xa4   : > { %v1581_v52 = vadd.f32 %v1529_v34, %v1419_v12  ;;  %v839_v37 = vadd.f32 %v803_v17, %v676_v21  ;;  %v1249_v16 = vmul.f32 %v2692_v40, %v3154_v56  ;;  %v1313_v38 = vmul.f32 %v2712_v42, %v3159_v33 }
  0xa5   : > { %v1473_v28 = vmul.f32 %v2739_v51, %v3154_v56  ;;  %v1016_v48 = vsel %vm598_vm1, %v1014_v58, %v1015_v23  ;;  %v1389_v34 = vrot.slane %v1311_v1, 1  ;;  %v1475_v4 = vmul.f32 %v2739_v51, %v3159_v33 }
  0xa6   : > { %v1609_v6 = vadd.f32 %v2742_v59, %v1581_v52  ;;  %v890_v50 = vadd.f32 %v874_v2, %v839_v37  ;;  %v1178_v27 = vsel %vm761_vm2, %v1176_v46, %v1177_v60  ;;  %v1390_v35 = vrot.slane %v1313_v38, 1 }
  0xa7   : > { %v1551_v8 = vrot.slane %v1473_v28, 2  ;;  %v1552_v61 = vrot.slane %v1475_v4, 2  ;;  %v488_v12 = vmul.f32 %v2825_v41, %v2819_v43  ;;  %v542_v22 = vmul.f32 %v2602_v11, %v2819_v43 }
  0xa8   : > { %v1641_v7 = vmul.f32 0.70710677, %v1609_v6  ;;  %v2245_v62 = vpop.eup %2244  ;;  %v1052_v21 = vadd.f32 %v1016_v48, %v890_v50  ;;  %v1391_v17 = vsel %vm598_vm1, %v1389_v34, %v1390_v35  ;;  %v544_v58 = vmul.f32 %v2602_v11, %v2858_v20 }
  0xa9   : > { %v705_v2 = vmul.f32 %v2611_v14, %v2819_v43  ;;  %v1678_v23 = vadd.f32 1.0, %v2245_v62  ;;  %v1553_v52 = vsel %vm761_vm2, %v1551_v8, %v1552_v61  ;;  %v611_v46 = vrot.slane %v542_v22, 1 }
  0xaa   : > { %2246 = verf.f32 %v1641_v7  ;;  %v1214_v60 = vadd.f32 %v1178_v27, %v1052_v21  ;;  %v612_v1 = vrot.slane %v544_v58, 1  ;;  %v707_v37 = vmul.f32 %v2611_v14, %v2858_v20  ;;  %v374_v58 = vld [vmem:[%s2543_s10 + $0x70] sm:$0xff] }
  0xab   : > { %v774_v38 = vrot.slane %v705_v2, 2  ;;  %v1694_v28 = vmul.f32 %v1678_v23, %v1630_v18  ;;  %v865_v48 = vmul.f32 %v2843_v26, %v3029_v0  ;;  %v919_v34 = vmul.f32 %v2660_v44, %v3029_v0 }
  0xac   : > { %v921_v43 = vmul.f32 %v2660_v44, %v3054_v53  ;;  %v1265_v4 = vadd.f32 %v1249_v16, %v1214_v60  ;;  %v613_v50 = vsel %vm598_vm1, %v611_v46, %v612_v1  ;;  %v775_v27 = vrot.slane %v707_v37, 2  ;;  %v3547_v46 = vld [vmem:[#allocation11_spill] sm:$0xff] }
  0xad   : > { %v1081_v35 = vmul.f32 %v2682_v63, %v3029_v0  ;;  %1830 = vmatmul.mubr.f32.gmra.mrb[2].mxu1 %v1694_v28  ;;  %v667_v20 = vadd.f32 %v613_v50, %v488_v12  ;;  %v987_v18 = vrot.slane %v919_v34, 1  ;;  %v1083_v7 = vmul.f32 %v2682_v63, %v3054_v53  ;;  %v3548_v12 = vld [vmem:[#allocation12_spill] sm:$0xff] }
  0xae   : > { %v988_v8 = vrot.slane %v921_v43, 1  ;;  %v1625_v61 = vmul.f32 0.5, %v1609_v6  ;;  %v1427_v22 = vadd.f32 %v1391_v17, %v1265_v4  ;;  %v776_v62 = vsel %vm761_vm2, %v774_v38, %v775_v27 }
  0xaf   : > { %v1149_v21 = vrot.slane %v1081_v35, 2  ;;  %v830_v16 = vadd.f32 %v776_v62, %v667_v20  ;;  %v1150_v23 = vrot.slane %v1083_v7, 2  ;;  %v1294_v60 = vmul.f32 %v2699_v19, %v3547_v46 }
  0xb0   : > { %v989_v2 = vsel %vm598_vm1, %v987_v18, %v988_v8  ;;  %v1589_v1 = vadd.f32 %v1553_v52, %v1427_v22  ;;  %v1296_v37 = vmul.f32 %v2699_v19, %v3548_v12  ;;  %v1456_v28 = vmul.f32 %v2730_v45, %v3547_v46 }
  0xb1   : > { %v1458_v6 = vmul.f32 %v2730_v45, %v3548_v12  ;;  %v881_v17 = vadd.f32 %v865_v48, %v830_v16  ;;  %v1151_v38 = vsel %vm761_vm2, %v1149_v21, %v1150_v23  ;;  %v1362_v34 = vrot.slane %v1294_v60, 1 }
  0xb2   : > { %v408_v43 = vrot.slane %v374_v58, 7  ;;  %v1617_v4 = vadd.f32 %v2742_v59, %v1589_v1  ;;  %v1363_v50 = vrot.slane %v1296_v37, 1  ;;  %v1524_v27 = vrot.slane %v1456_v28, 2 }
  0xb3   : > { %v1525_v35 = vrot.slane %v1458_v6, 2  ;;  %v1043_v20 = vadd.f32 %v989_v2, %v881_v17  ;;  %v1240_v18 = vmul.f32 %v2865_v25, %v3547_v46  ;;  %v496_v21 = vmul.f32 %v2825_v41, %v3544_v24 }
  0xb4   : > { %v2247_v52 = vpop.eup %2246  ;;  %v3234_v8 = vsel %vm427_vm0, 0.0, %v408_v43  ;;  %v3237_v7 = vsel %vm427_vm0, %v408_v43, 0.0  ;;  %v1649_v22 = vmul.f32 0.70710677, %v1617_v4  ;;  %v1364_v62 = vsel %vm598_vm1, %v1362_v34, %v1363_v50 }
  0xb5   : > { %v1673_v48 = vadd.f32 1.0, %v2247_v52  ;;  %v1205_v58 = vadd.f32 %v1151_v38, %v1043_v20  ;;  %v1526_v16 = vsel %vm761_vm2, %v1524_v27, %v1525_v35  ;;  %v558_v2 = vmul.f32 %v2602_v11, %v3544_v24 }
  0xb6   : > { %v560_v23 = vmul.f32 %v2602_v11, %v2898_v31  ;;  %2248 = verf.f32 %v1649_v22  ;;  %v721_v1 = vmul.f32 %v2611_v14, %v3544_v24  ;;  %v723_v37 = vmul.f32 %v2611_v14, %v2898_v31 }
  0xb7   : > { %v1689_v60 = vmul.f32 %v1673_v48, %v1625_v61  ;;  %v1256_v28 = vadd.f32 %v1240_v18, %v1205_v58  ;;  %v635_v6 = vrot.slane %v558_v2, 1  ;;  %v873_v38 = vmul.f32 %v2843_v26, %v3073_v36 }
  0xb8   : > { %v636_v17 = vrot.slane %v560_v23, 1  ;;  %v798_v34 = vrot.slane %v721_v1, 2  ;;  %v799_v43 = vrot.slane %v723_v37, 2  ;;  %v935_v50 = vmul.f32 %v2660_v44, %v3073_v36 }
  0xb9   : > { %1814 = vmatprep.mubr.f32.mxu0 %v1689_v60  ;;  %v937_v61 = vmul.f32 %v2660_v44, %v3076_v57  ;;  %v1418_v27 = vadd.f32 %v1364_v62, %v1256_v28  ;;  %v1097_v31 = vmul.f32 %v2682_v63, %v3073_v36  ;;  %v1099_v35 = vmul.f32 %v2682_v63, %v3076_v57 }
  0xba   : > { %v637_v24 = vsel %vm598_vm1, %v635_v6, %v636_v17  ;;  %v800_v20 = vsel %vm761_vm2, %v798_v34, %v799_v43  ;;  %v1011_v18 = vrot.slane %v935_v50, 1  ;;  %v1633_v22 = vmul.f32 0.5, %v1617_v4 }
  0xbb   : > { %v675_v52 = vadd.f32 %v637_v24, %v496_v21  ;;  %v1012_v48 = vrot.slane %v937_v61, 1  ;;  %v1580_v58 = vadd.f32 %v1526_v16, %v1418_v27  ;;  %v1173_v2 = vrot.slane %v1097_v31, 2 }
  0xbc   : > { %v1174_v23 = vrot.slane %v1099_v35, 2  ;;  %v1248_v62 = vmul.f32 %v2865_v25, %v3234_v8  ;;  %v1310_v1 = vmul.f32 %v2699_v19, %v3234_v8  ;;  %v1312_v37 = vmul.f32 %v2699_v19, %v3237_v7 }
  0xbd   : > { %v838_v60 = vadd.f32 %v800_v20, %v675_v52  ;;  %v1608_v21 = vadd.f32 %v2721_v39, %v1580_v58  ;;  %v1013_v28 = vsel %vm598_vm1, %v1011_v18, %v1012_v48  ;;  %v1472_v4 = vmul.f32 %v2730_v45, %v3234_v8 }
  0xbe   : > { %v1474_v16 = vmul.f32 %v2730_v45, %v3237_v7  ;;  %v1175_v17 = vsel %vm761_vm2, %v1173_v2, %v1174_v23  ;;  %v1386_v34 = vrot.slane %v1310_v1, 1  ;;  %v1387_v43 = vrot.slane %v1312_v37, 1 }
  0xbf   : > { %v889_v6 = vadd.f32 %v873_v38, %v838_v60  ;;  %v1640_v50 = vmul.f32 0.70710677, %v1608_v21  ;;  %v1548_v61 = vrot.slane %v1472_v4, 2  ;;  %v491_v24 = vmul.f32 %v2599_v10, %v2945_v9 }
  0xc0   : > { %v1549_v27 = vrot.slane %v1474_v16, 2  ;;  %v2249_v31 = vpop.eup %2248  ;;  %v1388_v52 = vsel %vm598_vm1, %v1386_v34, %v1387_v43  ;;  %v547_v20 = vmul.f32 %v2608_v13, %v2945_v9  ;;  %v549_v38 = vmul.f32 %v2608_v13, %v2956_v5 }
  0xc1   : > { %v1051_v35 = vadd.f32 %v1013_v28, %v889_v6  ;;  %v1681_v18 = vadd.f32 1.0, %v2249_v31  ;;  %2250 = verf.f32 %v1640_v50  ;;  %v710_v58 = vmul.f32 %v2614_v15, %v2945_v9 }
  0xc2   : > { %v1550_v48 = vsel %vm761_vm2, %v1548_v61, %v1549_v27  ;;  %v620_v23 = vrot.slane %v547_v20, 1  ;;  %v621_v60 = vrot.slane %v549_v38, 1  ;;  %v712_v1 = vmul.f32 %v2614_v15, %v2956_v5 }
  0xc3   : > { %v1213_v2 = vadd.f32 %v1175_v17, %v1051_v35  ;;  %v1697_v37 = vmul.f32 %v1681_v18, %v1633_v22  ;;  %v783_v28 = vrot.slane %v710_v58, 2  ;;  %v868_v4 = vmul.f32 %v2648_v29, %v3545_v32 }
  0xc4   : > { %v924_v16 = vmul.f32 %v2667_v47, %v3545_v32  ;;  %v622_v34 = vsel %vm598_vm1, %v620_v23, %v621_v60  ;;  %v784_v43 = vrot.slane %v712_v1, 2  ;;  %v926_v9 = vmul.f32 %v2667_v47, %v3546_v30 }
  0xc5   : > { %v1264_v6 = vadd.f32 %v1248_v62, %v1213_v2  ;;  %1834 = vmatprep.mubr.f32.mxu1 %v1697_v37  ;;  %v670_v17 = vadd.f32 %v622_v34, %v491_v24  ;;  %v1086_v5 = vmul.f32 %v2689_v3, %v3545_v32  ;;  %v1088_v22 = vmul.f32 %v2689_v3, %v3546_v30  ;;  %v3549_v2 = vld [vmem:[#allocation10_spill] sm:$0xff] }
  0xc6   : > { %v996_v50 = vrot.slane %v924_v16, 1  ;;  %v1624_v61 = vmul.f32 0.5, %v1608_v21  ;;  %v785_v31 = vsel %vm761_vm2, %v783_v28, %v784_v43  ;;  %v997_v62 = vrot.slane %v926_v9, 1 }
  0xc7   : > { %v1426_v27 = vadd.f32 %v1388_v52, %v1264_v6  ;;  %v833_v35 = vadd.f32 %v785_v31, %v670_v17  ;;  %v1158_v20 = vrot.slane %v1086_v5, 2  ;;  %v1159_v38 = vrot.slane %v1088_v22, 2 }
  0xc8   : > { %v1299_v18 = vmul.f32 %v2712_v42, %v2747_v54  ;;  %v998_v24 = vsel %vm598_vm1, %v996_v50, %v997_v62  ;;  %v1301_v32 = vmul.f32 %v2712_v42, %v3549_v2  ;;  %v1461_v30 = vmul.f32 %v2739_v51, %v2747_v54 }
  0xc9   : > { %v1588_v58 = vadd.f32 %v1550_v48, %v1426_v27  ;;  %v884_v21 = vadd.f32 %v868_v4, %v833_v35  ;;  %v1243_v52 = vmul.f32 %v2692_v40, %v2747_v54  ;;  %v1463_v60 = vmul.f32 %v2739_v51, %v3549_v2 }
  0xca   : > { %v1371_v23 = vrot.slane %v1299_v18, 1  ;;  %v1160_v48 = vsel %vm761_vm2, %v1158_v20, %v1159_v38  ;;  %v1372_v37 = vrot.slane %v1301_v32, 1  ;;  %v1533_v28 = vrot.slane %v1461_v30, 2 }
  0xcb   : > { %v1616_v1 = vadd.f32 %v2721_v39, %v1588_v58  ;;  %v2251_v16 = vpop.eup %2250  ;;  %v1046_v6 = vadd.f32 %v998_v24, %v884_v21  ;;  %v1534_v34 = vrot.slane %v1463_v60, 2  ;;  %v563_v43 = vmul.f32 %v2608_v13, %v2982_v55 }
  0xcc   : > { %v565_v4 = vmul.f32 %v2608_v13, %v2987_v49  ;;  %v1672_v54 = vadd.f32 1.0, %v2251_v16  ;;  %v1373_v17 = vsel %vm598_vm1, %v1371_v23, %v1372_v37  ;;  %v499_v50 = vmul.f32 %v2599_v10, %v2982_v55  ;;  %v3551_v16 = vld [vmem:[#allocation7_spill] sm:$0xff] }
  0xcd   : > { %v1648_v9 = vmul.f32 0.70710677, %v1616_v1  ;;  %v1208_v5 = vadd.f32 %v1160_v48, %v1046_v6  ;;  %v1535_v22 = vsel %vm761_vm2, %v1533_v28, %v1534_v34  ;;  %v644_v27 = vrot.slane %v563_v43, 1 }
  0xce   : > { %v645_v31 = vrot.slane %v565_v4, 1  ;;  %v1688_v62 = vmul.f32 %v1672_v54, %v1624_v61  ;;  %v726_v35 = vmul.f32 %v2614_v15, %v2982_v55  ;;  %v728_v13 = vmul.f32 %v2614_v15, %v2987_v49 }
  0xcf   : > { %2252 = verf.f32 %v1648_v9  ;;  %v1259_v20 = vadd.f32 %v1243_v52, %v1208_v5  ;;  %v876_v18 = vmul.f32 %v2648_v29, %v3154_v56  ;;  %v940_v10 = vmul.f32 %v2667_v47, %v3154_v56  ;;  %v3550_v52 = vld [vmem:[#allocation6_spill] sm:$0xff] }
  0xd0   : > { %v646_v38 = vsel %vm598_vm1, %v644_v27, %v645_v31  ;;  %1815 = vmatmul.mubr.f32.gmra.mrb[4].mxu0 %v1688_v62  ;;  %v807_v24 = vrot.slane %v726_v35, 2  ;;  %v808_v61 = vrot.slane %v728_v13, 2  ;;  %v942_v2 = vmul.f32 %v2667_v47, %v3159_v33 }
  0xd1   : > { %v678_v58 = vadd.f32 %v646_v38, %v499_v50  ;;  %v1421_v55 = vadd.f32 %v1373_v17, %v1259_v20  ;;  %v1020_v32 = vrot.slane %v940_v10, 1  ;;  %v1102_v15 = vmul.f32 %v2689_v3, %v3154_v56 }
  0xd2   : > { %v1104_v49 = vmul.f32 %v2689_v3, %v3159_v33  ;;  %v1632_v30 = vmul.f32 0.5, %v1616_v1  ;;  %v809_v29 = vsel %vm761_vm2, %v807_v24, %v808_v61  ;;  %v1021_v21 = vrot.slane %v942_v2, 1 }
  0xd3   : > { %v1315_v23 = vmul.f32 %v2712_v42, %v3550_v52  ;;  %v1583_v60 = vadd.f32 %v1535_v22, %v1421_v55  ;;  %v841_v48 = vadd.f32 %v809_v29, %v678_v58  ;;  %v1182_v37 = vrot.slane %v1102_v15, 2 }
  0xd4   : > { %v1183_v28 = vrot.slane %v1104_v49, 2  ;;  %v1022_v47 = vsel %vm598_vm1, %v1020_v32, %v1021_v21  ;;  %v1317_v6 = vmul.f32 %v2712_v42, %v3551_v16  ;;  %v1477_v3 = vmul.f32 %v2739_v51, %v3550_v52 }
  0xd5   : > { %v1395_v56 = vrot.slane %v1315_v23, 1  ;;  %v1611_v33 = vadd.f32 %v2742_v59, %v1583_v60  ;;  %v892_v1 = vadd.f32 %v876_v18, %v841_v48  ;;  %v1251_v34 = vmul.f32 %v2692_v40, %v3550_v52 }
  0xd6   : > { %v1479_v43 = vmul.f32 %v2739_v51, %v3551_v16  ;;  %v1184_v4 = vsel %vm761_vm2, %v1182_v37, %v1183_v28  ;;  %v1396_v54 = vrot.slane %v1317_v6, 1  ;;  %v1557_v9 = vrot.slane %v1477_v3, 2  ;;  %v3552_v6 = vld [vmem:[#allocation13_spill] sm:$0xff]  ;;  %v3553_v3 = vld [vmem:[#allocation15_spill] sm:$0xff] }
  0xd7   : > { %v546_v42 = vmul.f32 %v2602_v11, %v3029_v0  ;;  %v1643_v17 = vmul.f32 0.70710677, %v1611_v33  ;;  %v1054_v50 = vadd.f32 %v1022_v47, %v892_v1  ;;  %v490_v22 = vmul.f32 %v2825_v41, %v3029_v0 }
  0xd8   : > { %v1558_v5 = vrot.slane %v1479_v43, 2  ;;  %v1397_v31 = vsel %vm598_vm1, %v1395_v56, %v1396_v54  ;;  %v548_v40 = vmul.f32 %v2602_v11, %v3054_v53  ;;  %v709_v62 = vmul.f32 %v2611_v14, %v3029_v0 }
  0xd9   : > { %v2253_v27 = vpop.eup %2252  ;;  %v617_v51 = vrot.slane %v546_v42, 1  ;;  %2254 = verf.f32 %v1643_v17  ;;  %v1216_v13 = vadd.f32 %v1184_v4, %v1054_v50  ;;  %v711_v18 = vmul.f32 %v2611_v14, %v3054_v53 }
  0xda   : > { %v1680_v35 = vadd.f32 1.0, %v2253_v27  ;;  %v1559_v20 = vsel %vm761_vm2, %v1557_v9, %v1558_v5  ;;  %v618_v38 = vrot.slane %v548_v40, 1  ;;  %v780_v10 = vrot.slane %v709_v62, 2 }
  0xdb   : > { %v867_v58 = vmul.f32 %v2843_v26, %v3547_v46  ;;  %v1267_v61 = vadd.f32 %v1251_v34, %v1216_v13  ;;  %v923_v2 = vmul.f32 %v2660_v44, %v3547_v46  ;;  %v925_v0 = vmul.f32 %v2660_v44, %v3548_v12 }
  0xdc   : > { %v1696_v24 = vmul.f32 %v1680_v35, %v1632_v30  ;;  %v619_v55 = vsel %vm598_vm1, %v617_v51, %v618_v38  ;;  %v781_v32 = vrot.slane %v711_v18, 2  ;;  %v1085_v15 = vmul.f32 %v2682_v63, %v3547_v46 }
  0xdd   : > { %v1087_v53 = vmul.f32 %v2682_v63, %v3548_v12  ;;  %v1429_v49 = vadd.f32 %v1397_v31, %v1267_v61  ;;  %v669_v29 = vadd.f32 %v619_v55, %v490_v22  ;;  %v993_v30 = vrot.slane %v923_v2, 1 }
  0xde   : > { %1835 = vmatmul.mubr.f32.gmra.mrb[4].mxu1 %v1696_v24  ;;  %v994_v21 = vrot.slane %v925_v0, 1  ;;  %v782_v23 = vsel %vm761_vm2, %v780_v10, %v781_v32  ;;  %v1155_v60 = vrot.slane %v1085_v15, 2  ;;  %v1627_v37 = vmul.f32 0.5, %v1611_v33 }
  0xdf   : > { %v1156_v48 = vrot.slane %v1087_v53, 2  ;;  %v1591_v28 = vadd.f32 %v1559_v20, %v1429_v49  ;;  %v832_v47 = vadd.f32 %v782_v23, %v669_v29  ;;  %v1298_v56 = vmul.f32 %v2699_v19, %v3552_v6 }
  0xe0   : > { %v995_v46 = vsel %vm598_vm1, %v993_v30, %v994_v21  ;;  %v1300_v12 = vmul.f32 %v2699_v19, %v3553_v3  ;;  %v1460_v1 = vmul.f32 %v2730_v45, %v3552_v6  ;;  %v1462_v34 = vmul.f32 %v2730_v45, %v3553_v3 }
  0xe1   : > { %v1619_v43 = vadd.f32 %v2742_v59, %v1591_v28  ;;  %v883_v4 = vadd.f32 %v867_v58, %v832_v47  ;;  %v1157_v33 = vsel %vm761_vm2, %v1155_v60, %v1156_v48  ;;  %v1368_v54 = vrot.slane %v1298_v56, 1 }
  0xe2   : > { %v1369_v9 = vrot.slane %v1300_v12, 1  ;;  %v1530_v42 = vrot.slane %v1460_v1, 2  ;;  %v1531_v17 = vrot.slane %v1462_v34, 2  ;;  %v562_v50 = vmul.f32 %v2602_v11, %v3073_v36 }
  0xe3   : > { %v2255_v5 = vpop.eup %2254  ;;  %v1651_v22 = vmul.f32 0.70710677, %v1619_v43  ;;  %v1045_v27 = vadd.f32 %v995_v46, %v883_v4  ;;  %v1242_v31 = vmul.f32 %v2865_v25, %v3552_v6  ;;  %v564_v40 = vmul.f32 %v2602_v11, %v3076_v57 }
  0xe4   : > { %v1675_v59 = vadd.f32 1.0, %v2255_v5  ;;  %v1370_v51 = vsel %vm598_vm1, %v1368_v54, %v1369_v9  ;;  %v498_v62 = vmul.f32 %v2825_v41, %v3073_v36  ;;  %v641_v35 = vrot.slane %v562_v50, 1 }
  0xe5   : > { %2256 = verf.f32 %v1651_v22  ;;  %v1207_v13 = vadd.f32 %v1157_v33, %v1045_v27  ;;  %v642_v20 = vrot.slane %v564_v40, 1  ;;  %v725_v38 = vmul.f32 %v2611_v14, %v3073_v36 }
  0xe6   : > { %v1691_v18 = vmul.f32 %v1675_v59, %v1627_v37  ;;  %v1532_v10 = vsel %vm761_vm2, %v1530_v42, %v1531_v17  ;;  %v727_v58 = vmul.f32 %v2611_v14, %v3076_v57  ;;  %v939_v11 = vmul.f32 %v2660_v44, %v3234_v8 }
  0xe7   : > { %v1258_v24 = vadd.f32 %v1242_v31, %v1207_v13  ;;  %v643_v61 = vsel %vm598_vm1, %v641_v35, %v642_v20  ;;  %v804_v41 = vrot.slane %v725_v38, 2  ;;  %v941_v2 = vmul.f32 %v2660_v44, %v3237_v7 }
  0xe8   : > { %1819 = vmatprep.mubr.f32.mxu0 %v1691_v18  ;;  %v677_v0 = vadd.f32 %v643_v61, %v498_v62  ;;  %v805_v55 = vrot.slane %v727_v58, 2  ;;  %v1017_v36 = vrot.slane %v939_v11, 1  ;;  %v1101_v32 = vmul.f32 %v2682_v63, %v3234_v8 }
  0xe9   : > { %v1420_v15 = vadd.f32 %v1370_v51, %v1258_v24  ;;  %v875_v14 = vmul.f32 %v2843_v26, %v3234_v8  ;;  %v1018_v57 = vrot.slane %v941_v2, 1  ;;  %v1103_v53 = vmul.f32 %v2682_v63, %v3237_v7 }
  0xea   : > { %v806_v49 = vsel %vm761_vm2, %v804_v41, %v805_v55  ;;  %v1179_v29 = vrot.slane %v1101_v32, 2  ;;  %v1314_v44 = vmul.f32 %v2699_v19, %v3550_v52  ;;  %v1316_v30 = vmul.f32 %v2699_v19, %v3551_v16 }
  0xeb   : > { %v1582_v21 = vadd.f32 %v1532_v10, %v1420_v15  ;;  %v840_v23 = vadd.f32 %v806_v49, %v677_v0  ;;  %v1180_v60 = vrot.slane %v1103_v53, 2  ;;  %v1019_v48 = vsel %vm598_vm1, %v1017_v36, %v1018_v57 }
  0xec   : > { %v1476_v26 = vmul.f32 %v2730_v45, %v3550_v52  ;;  %v1478_v63 = vmul.f32 %v2730_v45, %v3551_v16  ;;  %v1635_v37 = vmul.f32 0.5, %v1619_v43  ;;  %v1392_v47 = vrot.slane %v1314_v44, 1 }
  0xed   : > { %v1610_v8 = vadd.f32 %v2721_v39, %v1582_v21  ;;  %v891_v7 = vadd.f32 %v875_v14, %v840_v23  ;;  %v1181_v28 = vsel %vm761_vm2, %v1179_v29, %v1180_v60  ;;  %v1393_v6 = vrot.slane %v1316_v30, 1 }
  0xee   : > { %v1250_v3 = vmul.f32 %v2865_v25, %v3550_v52  ;;  %v1554_v1 = vrot.slane %v1476_v26, 2  ;;  %v1555_v34 = vrot.slane %v1478_v63, 2 }
  0xef   : > { %v2257_v19 = vpop.eup %2256  ;;  %v1642_v56 = vmul.f32 0.70710677, %v1610_v8  ;;  %v1053_v46 = vadd.f32 %v1019_v48, %v891_v7  ;;  %v1394_v16 = vsel %vm598_vm1, %v1392_v47, %v1393_v6  ;;  %v1626_v17 = vmul.f32 0.5, %v1610_v8 }
  0xf0   : > { %v1683_v12 = vadd.f32 1.0, %v2257_v19  ;;  %v1556_v43 = vsel %vm761_vm2, %v1554_v1, %v1555_v34 }
  0xf1   : > { %2258 = verf.f32 %v1642_v56  ;;  %v1215_v4 = vadd.f32 %v1181_v28, %v1053_v46 }
  0xf2   : > { %v1699_v45 = vmul.f32 %v1683_v12, %v1635_v37 }
  0xf3   : > { %v1266_v33 = vadd.f32 %v1250_v3, %v1215_v4 }
  0xf4   : > { %1839 = vmatprep.mubr.f32.mxu1 %v1699_v45 }
  0xf5   : > { %v1428_v54 = vadd.f32 %v1394_v16, %v1266_v33 }
  0xf7   : > { %v1590_v9 = vadd.f32 %v1556_v43, %v1428_v54 }
  0xf9   : > { %v1618_v42 = vadd.f32 %v2721_v39, %v1590_v9  ;;  %v2060_v39 = vld [vmem:[%s3504_s4] ss:$0 sm:$0xff] }
  0xfb   : > { %v2259_v25 = vpop.eup %2258  ;;  %v1650_v52 = vmul.f32 0.70710677, %v1618_v42  ;;  %v1634_v22 = vmul.f32 0.5, %v1618_v42 }
  0xfc   : > { %v1674_v50 = vadd.f32 1.0, %v2259_v25 }
  0xfd   : > { %2260 = verf.f32 %v1650_v52 }
  0xfe   : > { %v1690_v5 = vmul.f32 %v1674_v50, %v1626_v17 }
 0x100   : > { %1820 = vmatmul.mubr.f32.gmra.mrb[6].mxu0 %v1690_v5 }
 0x107   : > { %v2261_v27 = vpop.eup %2260 }
 0x108   : > { %v1682_v31 = vadd.f32 1.0, %v2261_v27 }
 0x10a   : > { %v1698_v40 = vmul.f32 %v1682_v31, %v1634_v22 }
 0x10c   : > { %1840 = vmatmul.mubr.f32.gmra.mrb[6].mxu1 %v1698_v40 }
 0x140   : > { %v2100_v59 = vpop.f32.mrb[0].mxu0 }
 0x141   : > { %v2101_v51 = vpop.f32.mrb[1].mxu0 }
 0x142   : > { %v2102_v62 = vadd.f32 %v2101_v51, %v2100_v59 }
 0x144   : > { %v1879_v35 = vadd.f32 %v2102_v62, %v2060_v39 }
 0x146   : > { %1887 = vst [vmem:[%s3433_s15] sm:$0xff] %v1879_v35 }
 0x150   : > { %v2112_v13 = vpop.f32.mrb[0].mxu1 }
 0x151   : > { %v2113_v20 = vpop.f32.mrb[1].mxu1 }
 0x152   : > { %v2114_v38 = vadd.f32 %v2113_v20, %v2112_v13 }
 0x154   : > { %v1883_v18 = vadd.f32 %v2114_v38, %v2060_v39 }
 0x156   : > { %1891 = vst [vmem:[%s3433_s15 + $0x20] sm:$0xff] %v1883_v18 }
 0x173   : > { %v2103_v10 = vpop.f32.mrb[2].mxu0 }
 0x174   : > { %v2104_v58 = vpop.f32.mrb[3].mxu0 }
 0x175   : > { %v2105_v11 = vadd.f32 %v2104_v58, %v2103_v10 }
 0x177   : > { %v1880_v24 = vadd.f32 %v2105_v11, %v2060_v39 }
 0x179   : > { %1888 = vst [vmem:[%s3433_s15 + $0x8] sm:$0xff] %v1880_v24 }
 0x180   : > { %v2115_v61 = vpop.f32.mrb[2].mxu1 }
 0x181   : > { %v2116_v41 = vpop.f32.mrb[3].mxu1 }
 0x182   : > { %v2117_v2 = vadd.f32 %v2116_v41, %v2115_v61 }
 0x184   : > { %v1884_v0 = vadd.f32 %v2117_v2, %v2060_v39 }
 0x186   : > { %1892 = vst [vmem:[%s3433_s15 + $0x28] sm:$0xff] %v1884_v0 }
 0x1a3   : > { %v2106_v55 = vpop.f32.mrb[4].mxu0 }
 0x1a4   : > { %v2107_v36 = vpop.f32.mrb[5].mxu0 }
 0x1a5   : > { %v2108_v32 = vadd.f32 %v2107_v36, %v2106_v55 }
 0x1a7   : > { %v1881_v15 = vadd.f32 %v2108_v32, %v2060_v39 }
 0x1a9   : > { %1889 = vst [vmem:[%s3433_s15 + $0x10] sm:$0xff] %v1881_v15 }
 0x1b1   : > { %v2118_v14 = vpop.f32.mrb[4].mxu1 }
 0x1b2   : > { %v2119_v57 = vpop.f32.mrb[5].mxu1 }
 0x1b3   : > { %v2120_v53 = vadd.f32 %v2119_v57, %v2118_v14 }
 0x1b5   : > { %v1885_v49 = vadd.f32 %v2120_v53, %v2060_v39 }
 0x1b7   : > { %1893 = vst [vmem:[%s3433_s15 + $0x30] sm:$0xff] %v1885_v49 }
 0x1d3   : > { %v2109_v29 = vpop.f32.mrb[6].mxu0 }
 0x1d4   : > { %v2110_v44 = vpop.f32.mrb[7].mxu0 }
 0x1d5   : > { %v2111_v30 = vadd.f32 %v2110_v44, %v2109_v29 }
 0x1d7   : > { %v1882_v21 = vadd.f32 %v2111_v30, %v2060_v39 }
 0x1d9   : > { %1890 = vst [vmem:[%s3433_s15 + $0x18] sm:$0xff] %v1882_v21 }
 0x1df   : > { %v2121_v23 = vpop.f32.mrb[6].mxu1 }
 0x1e0   : > { %v2122_v60 = vpop.f32.mrb[7].mxu1 }
 0x1e1   : > { %v2123_v48 = vadd.f32 %v2122_v60, %v2121_v23 }
 0x1e3   : > { %v1886_v26 = vadd.f32 %v2123_v48, %v2060_v39 }
 0x1e5   : > { %1894 = vst [vmem:[%s3433_s15 + $0x38] sm:$0xff] %v1886_v26 }
 0x1e6   : > { %2275 = shalt.err (!%p2272_p5)
}
 0x1e7   : > { %s2276_s11 = scalar_lea.hbm %s3447_s25, 1024  ;;  %s2280_s10 = scalar_lea.hbm %s3505_s5, 2048 }
 0x1e8   : > { %p2277_p6 = scmp.ne.s32.totalorder %s3447_s25, %s2276_s11  ;;  %p2281_p10 = scmp.lt.u32.totalorder %s3447_s25, %s3505_s5 }
 0x1e9   : > { %p2282_p11 = scmp.lt.u32.totalorder %s2280_s10, %s2276_s11  ;;  %p2284_p13 = scmp.lt.u32.totalorder %s2276_s11, %s3447_s25 }
 0x1ea   : > { %p2278_p7 = pnand %p2277_p6, %p2416_p4 }
 0x1eb   : > { %p2283_p12 = por %p2282_p11, %p2281_p10 }
 0x1ec   : > { %p2279_p9 = pneg %p2278_p7 }
 0x1ed   : > { %p2285_p0 = por %p2284_p13, %p2283_p12 }
 0x1ef   : > { %p2286_p1 = pnand %p2285_p0, %p2279_p9 }
 0x1f1   : > { %2289 = shalt.err (!%p2286_p1)
}
 0x1f2   : > { %s2344_s16 = smov 128   ;;  %s2345_s29 = smov 8  }
 0x1f3   : > { %2172 = dma.vmem_to_hbm [thread:$0]  (%p2416_p4), %s3449_s17, 1024, %s3447_s25, %s3454_s27, %s2344_s16, %s2344_s16, %s2345_s29  }
 0x1f4 PF: > { %p2178_p2 = scmp.ge.s32.totalorder %s2340_s23, 2  ;;  %s1925_s24 = sand.u32 1, %s2320_s18  }
 0x1f5   : > { %s1926_s7 = scalar_lea.sflag [#allocation4], %s1925_s24 }
 0x1f6   : > { %p2175_p3 = pnand %p2178_p2, %p2423_p8 }
 0x1f8   : > { %2315 = dma.done.wait (!%p2175_p3), %s1926_s7, 1024  }
 0x1f9   : > { %2317 = vsyncadd (!%p2175_p3), %s1926_s7, 4294966272  ;;  %s18_s23 = sadd.s32 1, %s2340_s23   ;;  %s3554_s18 = smov %s2324_s19 }
 0x1fa   : > { %p15_p5 = scmp.ge.s32.totalorder %s18_s23, 4   ;;  %s3555_s19 = smov %s2328_s20 }
 0x1fb   : > { %s3556_s20 = smov %s2429_s6  ;;  %s3557_s21 = smov %s2336_s22 }
 0x1fc   : > { %s3558_s22 = smov %s3560_s26  ;;  %17 = sbr.rel (!%p15_p5) target bundleno = 4 (0x4), region = 95 }
 0x203   :  { %1931 = vsyncpa [#allocation4], 1 }
 0x204   :  { %1933 = vsyncpa [#allocation4 + $0x1], 1 }

</bundles_post_ra>
